<compile_context>
chip_gen: v6e
topology: v6e:2x2x1
jax: 0.10.0
libtpu: 0.0.40
codegen_flags: <defaults>
</compile_context>

<pallas_src>
import functools
import math

import jax
import jax.numpy as jnp
from jax import lax
from jax.experimental import pallas as pl
from jax.experimental.pallas import tpu as pltpu


def mha_flash_kernel(q_ref, k_ref, v_ref,
                     wq_ref, bq_ref, wk_ref, bk_ref, wv_ref, bv_ref,
                     woh_ref, bo_ref,
                     o_ref,
                     q_scr, m_scr, l_scr, acc_scr,
                     *, n_heads: int, d_k: int):
    """Grid = (batch, q_tiles, kv_tiles); kv is the trailing reduction axis."""
    ki = pl.program_id(2)
    nk = pl.num_programs(2)

    # ---- init (first kv step of this q tile): project Q, reset accumulators ----
    @pl.when(ki == 0)
    def _init():
        # W_q / b_q already carry the 1/sqrt(d_k) scale (folded in the wrapper).
        qp = jnp.dot(q_ref[...], wq_ref[...],
                     preferred_element_type=jnp.float32) + bq_ref[...]
        for h in range(n_heads):
            q_scr[h] = qp[:, h * d_k:(h + 1) * d_k].astype(q_scr.dtype)
        m_scr[...] = jnp.full_like(m_scr, -jnp.inf)
        l_scr[...] = jnp.zeros_like(l_scr)
        acc_scr[...] = jnp.zeros_like(acc_scr)

    # ---- K/V projection for this kv tile (wide, lane-dense MXU matmuls) ----
    kp = (jnp.dot(k_ref[...], wk_ref[...],
                  preferred_element_type=jnp.float32) + bk_ref[...]
          ).astype(k_ref.dtype)
    vp = (jnp.dot(v_ref[...], wv_ref[...],
                  preferred_element_type=jnp.float32) + bv_ref[...]
          ).astype(v_ref.dtype)

    # ---- per-head online softmax update (heads statically unrolled) ----
    for h in range(n_heads):
        lo = h * d_k
        kh = kp[:, lo:lo + d_k]                      # (tkv, d_k)
        vh = vp[:, lo:lo + d_k]                      # (tkv, d_k)

        # scores = Qh @ Kh^T without materializing a transpose
        s = lax.dot_general(q_scr[h], kh, (((1,), (1,)), ((), ())),
                            preferred_element_type=jnp.float32)   # (tq, tkv)

        m_prev = m_scr[h]                            # (tq, 1)
        m_new = jnp.maximum(m_prev, s.max(axis=-1, keepdims=True))
        alpha = jnp.exp(m_prev - m_new)
        p = jnp.exp(s - m_new)
        l_scr[h] = alpha * l_scr[h] + p.sum(axis=-1, keepdims=True)
        acc_scr[h] = alpha * acc_scr[h] + jnp.dot(p.astype(vh.dtype), vh,
                                                  preferred_element_type=jnp.float32)
        m_scr[h] = m_new

    # ---- finalize (last kv step): normalize, output projection, store ----
    @pl.when(ki == nk - 1)
    def _finalize():
        acc_out = None
        for h in range(n_heads):
            # EUP approx reciprocal -> softmax divide is nearly free.
            ctx_h = acc_scr[h] * pl.reciprocal(l_scr[h], approx=True)   # (tq, d_k)
            contrib = jnp.dot(ctx_h, woh_ref[h],
                              preferred_element_type=jnp.float32)        # (tq, D)
            acc_out = contrib if acc_out is None else acc_out + contrib
        o_ref[...] = (acc_out + bo_ref[...]).astype(o_ref.dtype)


def _pick_tile(s: int, target: int) -> int:
    """Largest tile <= target that divides s (falls back to full extent)."""
    if s <= target:
        return s
    t = target
    while t >= 8:
        if s % t == 0:
            return t
        t //= 2
    return s


def init_params(key, d_model):
    """Deterministic init mimicking nn.Linear (weights stored as (in, out))."""
    ks = jax.random.split(key, 8)
    bound = 1.0 / math.sqrt(d_model)

    def lin(kw, kb):
        w = jax.random.uniform(kw, (d_model, d_model), jnp.float32, -bound, bound)
        b = jax.random.uniform(kb, (1, d_model), jnp.float32, -bound, bound)
        return w, b

    wq, bq = lin(ks[0], ks[1])
    wk, bk = lin(ks[2], ks[3])
    wv, bv = lin(ks[4], ks[5])
    wo, bo = lin(ks[6], ks[7])
    return dict(wq=wq, bq=bq, wk=wk, bk=bk, wv=wv, bv=bv, wo=wo, bo=bo)


def multi_head_attention(query, key, value, params, *, n_heads,
                         block_q=128, block_kv=128):
    B, Sq, D = query.shape
    _, Skv, _ = key.shape
    assert D % n_heads == 0
    d_k = D // n_heads

    tq = _pick_tile(Sq, block_q)
    tkv = _pick_tile(Skv, block_kv)
    grid = (B, Sq // tq, Skv // tkv)

    # Fold the 1/sqrt(d_k) scale into the Q projection; pre-split W_o per head.
    scale = 1.0 / math.sqrt(d_k)
    wq = params["wq"] * scale
    bq = params["bq"] * scale
    wo_heads = params["wo"].reshape(n_heads, d_k, D)

    x_q_spec = pl.BlockSpec((None, tq, D), lambda b, qi, ki: (b, qi, 0))
    x_kv_spec = pl.BlockSpec((None, tkv, D), lambda b, qi, ki: (b, ki, 0))
    w_spec = pl.BlockSpec((D, D), lambda b, qi, ki: (0, 0))
    b_spec = pl.BlockSpec((1, D), lambda b, qi, ki: (0, 0))
    woh_spec = pl.BlockSpec((n_heads, d_k, D), lambda b, qi, ki: (0, 0, 0))
    out_spec = pl.BlockSpec((None, tq, D), lambda b, qi, ki: (b, qi, 0))

    # VMEM budget (double-buffered blocks + weights + scratch), capped for v7x.
    dt = jnp.dtype(query.dtype).itemsize
    est = (2 * dt * (2 * tq * D + 2 * tkv * D)
           + 2 * 4 * (4 * D * D + 4 * D)
           + 4 * (2 * n_heads * tq * d_k + 2 * n_heads * tq)
           + dt * n_heads * tq * d_k)
    vmem_limit = int(min(64 << 20, max(32 << 20, 2 * est)))

    kernel = functools.partial(mha_flash_kernel, n_heads=n_heads, d_k=d_k)

    return pl.pallas_call(
        kernel,
        out_shape=jax.ShapeDtypeStruct((B, Sq, D), query.dtype),
        grid_spec=pltpu.PrefetchScalarGridSpec(
            num_scalar_prefetch=0,
            grid=grid,
            in_specs=[
                x_q_spec, x_kv_spec, x_kv_spec,
                w_spec, b_spec,     # W_q (pre-scaled), b_q (pre-scaled)
                w_spec, b_spec,     # W_k, b_k
                w_spec, b_spec,     # W_v, b_v
                woh_spec, b_spec,   # W_o reshaped (H, d_k, D), b_o
            ],
            out_specs=out_spec,
            scratch_shapes=[
                pltpu.VMEM((n_heads, tq, d_k), query.dtype),   # projected, scaled Q
                pltpu.VMEM((n_heads, tq, 1), jnp.float32),     # running max m
                pltpu.VMEM((n_heads, tq, 1), jnp.float32),     # running denom l
                pltpu.VMEM((n_heads, tq, d_k), jnp.float32),   # running context acc
            ],
        ),
        compiler_params=pltpu.CompilerParams(
            dimension_semantics=("parallel", "parallel", "arbitrary"),
            vmem_limit_bytes=vmem_limit,
        ),
    )(query, key, value,
      wq, bq,
      params["wk"], params["bk"],
      params["wv"], params["bv"],
      wo_heads, params["bo"])


def reference_mha(query, key, value, params, *, n_heads):
    """Pure-JAX reference replicating the PyTorch module (mask=None)."""
    B, Sq, D = query.shape
    _, Skv, _ = key.shape
    d_k = D // n_heads

    def proj(x, w, b):
        return x @ w + b  # w already (in, out)

    Q = proj(query, params["wq"], params["bq"]).reshape(B, Sq, n_heads, d_k).transpose(0, 2, 1, 3)
    K = proj(key, params["wk"], params["bk"]).reshape(B, Skv, n_heads, d_k).transpose(0, 2, 1, 3)
    V = proj(value, params["wv"], params["bv"]).reshape(B, Skv, n_heads, d_k).transpose(0, 2, 1, 3)

    scores = jnp.einsum("bhqd,bhkd->bhqk", Q, K) / math.sqrt(d_k)
    attn = jax.nn.softmax(scores, axis=-1)
    out = jnp.einsum("bhqk,bhkd->bhqd", attn, V)
    out = out.transpose(0, 2, 1, 3).reshape(B, Sq, D)
    return out @ params["wo"] + params["bo"]


if __name__ == "__main__":
    B, S, D_MODEL, N_HEADS = 2, 8, 32, 4

    root = jax.random.PRNGKey(0)
    kq, kk, kv, kp = jax.random.split(root, 4)

    query = jax.random.normal(kq, (B, S, D_MODEL), jnp.float32)
    key = jax.random.normal(kk, (B, S, D_MODEL), jnp.float32)
    value = jax.random.normal(kv, (B, S, D_MODEL), jnp.float32)
    params = init_params(kp, D_MODEL)

    out = multi_head_attention(query, key, value, params, n_heads=N_HEADS)
    out = jax.block_until_ready(out)

    ref = reference_mha(query, key, value, params, n_heads=N_HEADS)
    assert out.shape == (B, S, D_MODEL)
    # Tolerance accounts for the approx (EUP) reciprocal in the softmax denominator.
    assert jnp.allclose(out, ref, atol=2e-3, rtol=2e-3), "mismatch vs JAX reference"

    print("KERNEL_OK")
</pallas_src>

<mosaic_0001>
module attributes {stable_mosaic.version = 11 : i64} {
  func.func @mha_flash_kernel(%arg0: i32, %arg1: i32, %arg2: i32, %arg3: memref<1x8x32xf32, #tpu.memory_space<vmem>>, %arg4: memref<1x8x32xf32, #tpu.memory_space<vmem>>, %arg5: memref<1x8x32xf32, #tpu.memory_space<vmem>>, %arg6: memref<32x32xf32, #tpu.memory_space<vmem>>, %arg7: memref<1x32xf32, #tpu.memory_space<vmem>>, %arg8: memref<32x32xf32, #tpu.memory_space<vmem>>, %arg9: memref<1x32xf32, #tpu.memory_space<vmem>>, %arg10: memref<32x32xf32, #tpu.memory_space<vmem>>, %arg11: memref<1x32xf32, #tpu.memory_space<vmem>>, %arg12: memref<4x8x32xf32, #tpu.memory_space<vmem>>, %arg13: memref<1x32xf32, #tpu.memory_space<vmem>>, %arg14: memref<1x8x32xf32, #tpu.memory_space<vmem>>, %arg15: memref<4x8x8xf32, #tpu.memory_space<vmem>>, %arg16: memref<4x8x1xf32, #tpu.memory_space<vmem>>, %arg17: memref<4x8x1xf32, #tpu.memory_space<vmem>>, %arg18: memref<4x8x8xf32, #tpu.memory_space<vmem>>) attributes {dimension_semantics = [#tpu.dimension_semantics<parallel>, #tpu.dimension_semantics<parallel>, #tpu.dimension_semantics<arbitrary>], iteration_bounds = array<i64: 2, 1, 1>, scalar_prefetch = 0 : i64, scratch_operands = 4 : i64, tpu.core_type = #tpu.core_type<tc>, window_params = [{transform_indices = @transform_0, window_bounds = array<i64: 1, 8, 32>}, {transform_indices = @transform_1, window_bounds = array<i64: 1, 8, 32>}, {transform_indices = @transform_2, window_bounds = array<i64: 1, 8, 32>}, {pipeline_mode = #tpu.pipeline_mode<synchronous>, transform_indices = @transform_3, window_bounds = array<i64: 32, 32>}, {pipeline_mode = #tpu.pipeline_mode<synchronous>, transform_indices = @transform_4, window_bounds = array<i64: 1, 32>}, {pipeline_mode = #tpu.pipeline_mode<synchronous>, transform_indices = @transform_5, window_bounds = array<i64: 32, 32>}, {pipeline_mode = #tpu.pipeline_mode<synchronous>, transform_indices = @transform_6, window_bounds = array<i64: 1, 32>}, {pipeline_mode = #tpu.pipeline_mode<synchronous>, transform_indices = @transform_7, window_bounds = array<i64: 32, 32>}, {pipeline_mode = #tpu.pipeline_mode<synchronous>, transform_indices = @transform_8, window_bounds = array<i64: 1, 32>}, {pipeline_mode = #tpu.pipeline_mode<synchronous>, transform_indices = @transform_9, window_bounds = array<i64: 4, 8, 32>}, {pipeline_mode = #tpu.pipeline_mode<synchronous>, transform_indices = @transform_10, window_bounds = array<i64: 1, 32>}, {transform_indices = @transform_11, window_bounds = array<i64: 1, 8, 32>}]} {
    %c0_i32 = arith.constant 0 : i32
    %0 = arith.cmpi eq, %arg2, %c0_i32 : i32
    %1 = arith.extui %0 : i1 to i32
    %c0_i32_0 = arith.constant 0 : i32
    %2 = arith.cmpi ne, %1, %c0_i32_0 : i32
    scf.if %2 {
      %c0_114 = arith.constant 0 : index
      %c0_115 = arith.constant 0 : index
      %c0_116 = arith.constant 0 : index
      %164 = vector.load %arg3[%c0_114, %c0_115, %c0_116] : memref<1x8x32xf32, #tpu.memory_space<vmem>>, vector<1x8x32xf32>
      %165 = vector.shape_cast %164 : vector<1x8x32xf32> to vector<8x32xf32>
      %c0_117 = arith.constant 0 : index
      %c0_118 = arith.constant 0 : index
      %166 = vector.load %arg6[%c0_117, %c0_118] : memref<32x32xf32, #tpu.memory_space<vmem>>, vector<32x32xf32>
      %cst_119 = arith.constant dense<0.000000e+00> : vector<8x32xf32>
      %167 = tpu.matmul %165, %166, %cst_119 {dimension_numbers = #tpu.dot_dimension_numbers<[1], [0], [0], [1], [0, 0, 1, 1], [], []>} : vector<8x32xf32>, vector<32x32xf32>, vector<8x32xf32> -> vector<8x32xf32>
      %c0_120 = arith.constant 0 : index
      %c0_121 = arith.constant 0 : index
      %168 = vector.load %arg7[%c0_120, %c0_121] : memref<1x32xf32, #tpu.memory_space<vmem>>, vector<1x32xf32>
      %169 = vector.broadcast %168 : vector<1x32xf32> to vector<8x32xf32>
      %170 = arith.addf %167, %169 : vector<8x32xf32>
      %171 = vector.extract_strided_slice %170 {offsets = [0, 0], sizes = [8, 8], strides = [1, 1]} : vector<8x32xf32> to vector<8x8xf32>
      %c0_122 = arith.constant 0 : index
      %c0_123 = arith.constant 0 : index
      %c0_124 = arith.constant 0 : index
      %172 = vector.load %arg15[%c0_122, %c0_123, %c0_124] : memref<4x8x8xf32, #tpu.memory_space<vmem>>, vector<1x8x8xf32>
      %173 = vector.shape_cast %172 : vector<1x8x8xf32> to vector<8x8xf32>
      %174 = vector.shape_cast %171 : vector<8x8xf32> to vector<1x8x8xf32>
      tpu.vector_store %arg15[%c0_122, %c0_123, %c0_124], %174 {strides = array<i32>} : memref<4x8x8xf32, #tpu.memory_space<vmem>>, vector<1x8x8xf32>,
      %175 = vector.extract_strided_slice %170 {offsets = [0, 8], sizes = [8, 8], strides = [1, 1]} : vector<8x32xf32> to vector<8x8xf32>
      %c1_125 = arith.constant 1 : index
      %c0_126 = arith.constant 0 : index
      %c0_127 = arith.constant 0 : index
      %176 = vector.load %arg15[%c1_125, %c0_126, %c0_127] : memref<4x8x8xf32, #tpu.memory_space<vmem>>, vector<1x8x8xf32>
      %177 = vector.shape_cast %176 : vector<1x8x8xf32> to vector<8x8xf32>
      %178 = vector.shape_cast %175 : vector<8x8xf32> to vector<1x8x8xf32>
      tpu.vector_store %arg15[%c1_125, %c0_126, %c0_127], %178 {strides = array<i32>} : memref<4x8x8xf32, #tpu.memory_space<vmem>>, vector<1x8x8xf32>,
      %179 = vector.extract_strided_slice %170 {offsets = [0, 16], sizes = [8, 8], strides = [1, 1]} : vector<8x32xf32> to vector<8x8xf32>
      %c2_128 = arith.constant 2 : index
      %c0_129 = arith.constant 0 : index
      %c0_130 = arith.constant 0 : index
      %180 = vector.load %arg15[%c2_128, %c0_129, %c0_130] : memref<4x8x8xf32, #tpu.memory_space<vmem>>, vector<1x8x8xf32>
      %181 = vector.shape_cast %180 : vector<1x8x8xf32> to vector<8x8xf32>
      %182 = vector.shape_cast %179 : vector<8x8xf32> to vector<1x8x8xf32>
      tpu.vector_store %arg15[%c2_128, %c0_129, %c0_130], %182 {strides = array<i32>} : memref<4x8x8xf32, #tpu.memory_space<vmem>>, vector<1x8x8xf32>,
      %183 = vector.extract_strided_slice %170 {offsets = [0, 24], sizes = [8, 8], strides = [1, 1]} : vector<8x32xf32> to vector<8x8xf32>
      %c3_131 = arith.constant 3 : index
      %c0_132 = arith.constant 0 : index
      %c0_133 = arith.constant 0 : index
      %184 = vector.load %arg15[%c3_131, %c0_132, %c0_133] : memref<4x8x8xf32, #tpu.memory_space<vmem>>, vector<1x8x8xf32>
      %185 = vector.shape_cast %184 : vector<1x8x8xf32> to vector<8x8xf32>
      %186 = vector.shape_cast %183 : vector<8x8xf32> to vector<1x8x8xf32>
      tpu.vector_store %arg15[%c3_131, %c0_132, %c0_133], %186 {strides = array<i32>} : memref<4x8x8xf32, #tpu.memory_space<vmem>>, vector<1x8x8xf32>,
      %cst_134 = arith.constant 0xFF800000 : f32
      %187 = vector.broadcast %cst_134 : f32 to vector<4x8x1xf32>
      %c0_135 = arith.constant 0 : index
      %c0_136 = arith.constant 0 : index
      %c0_137 = arith.constant 0 : index
      %188 = vector.load %arg16[%c0_135, %c0_136, %c0_137] : memref<4x8x1xf32, #tpu.memory_space<vmem>>, vector<4x8x1xf32>
      tpu.vector_store %arg16[%c0_135, %c0_136, %c0_137], %187 {strides = array<i32>} : memref<4x8x1xf32, #tpu.memory_space<vmem>>, vector<4x8x1xf32>,
      %cst_138 = arith.constant 0.000000e+00 : f32
      %189 = vector.broadcast %cst_138 : f32 to vector<4x8x1xf32>
      %c0_139 = arith.constant 0 : index
      %c0_140 = arith.constant 0 : index
      %c0_141 = arith.constant 0 : index
      %190 = vector.load %arg17[%c0_139, %c0_140, %c0_141] : memref<4x8x1xf32, #tpu.memory_space<vmem>>, vector<4x8x1xf32>
      tpu.vector_store %arg17[%c0_139, %c0_140, %c0_141], %189 {strides = array<i32>} : memref<4x8x1xf32, #tpu.memory_space<vmem>>, vector<4x8x1xf32>,
      %cst_142 = arith.constant 0.000000e+00 : f32
      %191 = vector.broadcast %cst_142 : f32 to vector<4x8x8xf32>
      %c0_143 = arith.constant 0 : index
      %c0_144 = arith.constant 0 : index
      %c0_145 = arith.constant 0 : index
      %192 = vector.load %arg18[%c0_143, %c0_144, %c0_145] : memref<4x8x8xf32, #tpu.memory_space<vmem>>, vector<4x8x8xf32>
      tpu.vector_store %arg18[%c0_143, %c0_144, %c0_145], %191 {strides = array<i32>} : memref<4x8x8xf32, #tpu.memory_space<vmem>>, vector<4x8x8xf32>,
    } else {
    }
    %c0 = arith.constant 0 : index
    %c0_1 = arith.constant 0 : index
    %c0_2 = arith.constant 0 : index
    %3 = vector.load %arg4[%c0, %c0_1, %c0_2] : memref<1x8x32xf32, #tpu.memory_space<vmem>>, vector<1x8x32xf32>
    %4 = vector.shape_cast %3 : vector<1x8x32xf32> to vector<8x32xf32>
    %c0_3 = arith.constant 0 : index
    %c0_4 = arith.constant 0 : index
    %5 = vector.load %arg8[%c0_3, %c0_4] : memref<32x32xf32, #tpu.memory_space<vmem>>, vector<32x32xf32>
    %cst = arith.constant dense<0.000000e+00> : vector<8x32xf32>
    %6 = tpu.matmul %4, %5, %cst {dimension_numbers = #tpu.dot_dimension_numbers<[1], [0], [0], [1], [0, 0, 1, 1], [], []>} : vector<8x32xf32>, vector<32x32xf32>, vector<8x32xf32> -> vector<8x32xf32>
    %c0_5 = arith.constant 0 : index
    %c0_6 = arith.constant 0 : index
    %7 = vector.load %arg9[%c0_5, %c0_6] : memref<1x32xf32, #tpu.memory_space<vmem>>, vector<1x32xf32>
    %8 = vector.broadcast %7 : vector<1x32xf32> to vector<8x32xf32>
    %9 = arith.addf %6, %8 : vector<8x32xf32>
    %c0_7 = arith.constant 0 : index
    %c0_8 = arith.constant 0 : index
    %c0_9 = arith.constant 0 : index
    %10 = vector.load %arg5[%c0_7, %c0_8, %c0_9] : memref<1x8x32xf32, #tpu.memory_space<vmem>>, vector<1x8x32xf32>
    %11 = vector.shape_cast %10 : vector<1x8x32xf32> to vector<8x32xf32>
    %c0_10 = arith.constant 0 : index
    %c0_11 = arith.constant 0 : index
    %12 = vector.load %arg10[%c0_10, %c0_11] : memref<32x32xf32, #tpu.memory_space<vmem>>, vector<32x32xf32>
    %cst_12 = arith.constant dense<0.000000e+00> : vector<8x32xf32>
    %13 = tpu.matmul %11, %12, %cst_12 {dimension_numbers = #tpu.dot_dimension_numbers<[1], [0], [0], [1], [0, 0, 1, 1], [], []>} : vector<8x32xf32>, vector<32x32xf32>, vector<8x32xf32> -> vector<8x32xf32>
    %c0_13 = arith.constant 0 : index
    %c0_14 = arith.constant 0 : index
    %14 = vector.load %arg11[%c0_13, %c0_14] : memref<1x32xf32, #tpu.memory_space<vmem>>, vector<1x32xf32>
    %15 = vector.broadcast %14 : vector<1x32xf32> to vector<8x32xf32>
    %16 = arith.addf %13, %15 : vector<8x32xf32>
    %17 = vector.extract_strided_slice %9 {offsets = [0, 0], sizes = [8, 8], strides = [1, 1]} : vector<8x32xf32> to vector<8x8xf32>
    %18 = vector.extract_strided_slice %16 {offsets = [0, 0], sizes = [8, 8], strides = [1, 1]} : vector<8x32xf32> to vector<8x8xf32>
    %c0_15 = arith.constant 0 : index
    %c0_16 = arith.constant 0 : index
    %c0_17 = arith.constant 0 : index
    %19 = vector.load %arg15[%c0_15, %c0_16, %c0_17] : memref<4x8x8xf32, #tpu.memory_space<vmem>>, vector<1x8x8xf32>
    %20 = vector.shape_cast %19 : vector<1x8x8xf32> to vector<8x8xf32>
    %cst_18 = arith.constant dense<0.000000e+00> : vector<8x8xf32>
    %21 = tpu.matmul %20, %17, %cst_18 {dimension_numbers = #tpu.dot_dimension_numbers<[1], [1], [0], [0], [0, 0, 1, 0], [], []>} : vector<8x8xf32>, vector<8x8xf32>, vector<8x8xf32> -> vector<8x8xf32>
    %c0_19 = arith.constant 0 : index
    %c0_20 = arith.constant 0 : index
    %c0_21 = arith.constant 0 : index
    %22 = vector.load %arg16[%c0_19, %c0_20, %c0_21] : memref<4x8x1xf32, #tpu.memory_space<vmem>>, vector<1x8x1xf32>
    %23 = vector.shape_cast %22 : vector<1x8x1xf32> to vector<8x1xf32>
    %cst_22 = arith.constant dense<0xFF800000> : vector<8xf32>
    %24 = vector.multi_reduction <maximumf>, %21, %cst_22 [1] : vector<8x8xf32> to vector<8xf32>
    %25 = vector.shape_cast %24 : vector<8xf32> to vector<8x1xf32>
    %26 = arith.maximumf %23, %25 : vector<8x1xf32>
    %27 = arith.subf %23, %26 : vector<8x1xf32>
    %28 = math.exp %27 : vector<8x1xf32>
    %29 = vector.broadcast %26 : vector<8x1xf32> to vector<8x8xf32>
    %30 = arith.subf %21, %29 : vector<8x8xf32>
    %31 = math.exp %30 : vector<8x8xf32>
    %c0_23 = arith.constant 0 : index
    %c0_24 = arith.constant 0 : index
    %c0_25 = arith.constant 0 : index
    %32 = vector.load %arg17[%c0_23, %c0_24, %c0_25] : memref<4x8x1xf32, #tpu.memory_space<vmem>>, vector<1x8x1xf32>
    %33 = vector.shape_cast %32 : vector<1x8x1xf32> to vector<8x1xf32>
    %34 = arith.mulf %28, %33 : vector<8x1xf32>
    %cst_26 = arith.constant dense<0.000000e+00> : vector<8xf32>
    %35 = vector.multi_reduction <add>, %31, %cst_26 [1] : vector<8x8xf32> to vector<8xf32>
    %36 = vector.shape_cast %35 : vector<8xf32> to vector<8x1xf32>
    %37 = arith.addf %34, %36 : vector<8x1xf32>
    %c0_27 = arith.constant 0 : index
    %c0_28 = arith.constant 0 : index
    %c0_29 = arith.constant 0 : index
    %38 = vector.load %arg17[%c0_27, %c0_28, %c0_29] : memref<4x8x1xf32, #tpu.memory_space<vmem>>, vector<1x8x1xf32>
    %39 = vector.shape_cast %38 : vector<1x8x1xf32> to vector<8x1xf32>
    %40 = vector.shape_cast %37 : vector<8x1xf32> to vector<1x8x1xf32>
    tpu.vector_store %arg17[%c0_27, %c0_28, %c0_29], %40 {strides = array<i32>} : memref<4x8x1xf32, #tpu.memory_space<vmem>>, vector<1x8x1xf32>,
    %c0_30 = arith.constant 0 : index
    %c0_31 = arith.constant 0 : index
    %c0_32 = arith.constant 0 : index
    %41 = vector.load %arg18[%c0_30, %c0_31, %c0_32] : memref<4x8x8xf32, #tpu.memory_space<vmem>>, vector<1x8x8xf32>
    %42 = vector.shape_cast %41 : vector<1x8x8xf32> to vector<8x8xf32>
    %43 = vector.broadcast %28 : vector<8x1xf32> to vector<8x8xf32>
    %44 = arith.mulf %43, %42 : vector<8x8xf32>
    %cst_33 = arith.constant dense<0.000000e+00> : vector<8x8xf32>
    %45 = tpu.matmul %31, %18, %cst_33 {dimension_numbers = #tpu.dot_dimension_numbers<[1], [0], [0], [1], [0, 0, 1, 1], [], []>} : vector<8x8xf32>, vector<8x8xf32>, vector<8x8xf32> -> vector<8x8xf32>
    %46 = arith.addf %44, %45 : vector<8x8xf32>
    %c0_34 = arith.constant 0 : index
    %c0_35 = arith.constant 0 : index
    %c0_36 = arith.constant 0 : index
    %47 = vector.load %arg18[%c0_34, %c0_35, %c0_36] : memref<4x8x8xf32, #tpu.memory_space<vmem>>, vector<1x8x8xf32>
    %48 = vector.shape_cast %47 : vector<1x8x8xf32> to vector<8x8xf32>
    %49 = vector.shape_cast %46 : vector<8x8xf32> to vector<1x8x8xf32>
    tpu.vector_store %arg18[%c0_34, %c0_35, %c0_36], %49 {strides = array<i32>} : memref<4x8x8xf32, #tpu.memory_space<vmem>>, vector<1x8x8xf32>,
    %c0_37 = arith.constant 0 : index
    %c0_38 = arith.constant 0 : index
    %c0_39 = arith.constant 0 : index
    %50 = vector.load %arg16[%c0_37, %c0_38, %c0_39] : memref<4x8x1xf32, #tpu.memory_space<vmem>>, vector<1x8x1xf32>
    %51 = vector.shape_cast %50 : vector<1x8x1xf32> to vector<8x1xf32>
    %52 = vector.shape_cast %26 : vector<8x1xf32> to vector<1x8x1xf32>
    tpu.vector_store %arg16[%c0_37, %c0_38, %c0_39], %52 {strides = array<i32>} : memref<4x8x1xf32, #tpu.memory_space<vmem>>, vector<1x8x1xf32>,
    %53 = vector.extract_strided_slice %9 {offsets = [0, 8], sizes = [8, 8], strides = [1, 1]} : vector<8x32xf32> to vector<8x8xf32>
    %54 = vector.extract_strided_slice %16 {offsets = [0, 8], sizes = [8, 8], strides = [1, 1]} : vector<8x32xf32> to vector<8x8xf32>
    %c1 = arith.constant 1 : index
    %c0_40 = arith.constant 0 : index
    %c0_41 = arith.constant 0 : index
    %55 = vector.load %arg15[%c1, %c0_40, %c0_41] : memref<4x8x8xf32, #tpu.memory_space<vmem>>, vector<1x8x8xf32>
    %56 = vector.shape_cast %55 : vector<1x8x8xf32> to vector<8x8xf32>
    %cst_42 = arith.constant dense<0.000000e+00> : vector<8x8xf32>
    %57 = tpu.matmul %56, %53, %cst_42 {dimension_numbers = #tpu.dot_dimension_numbers<[1], [1], [0], [0], [0, 0, 1, 0], [], []>} : vector<8x8xf32>, vector<8x8xf32>, vector<8x8xf32> -> vector<8x8xf32>
    %c1_43 = arith.constant 1 : index
    %c0_44 = arith.constant 0 : index
    %c0_45 = arith.constant 0 : index
    %58 = vector.load %arg16[%c1_43, %c0_44, %c0_45] : memref<4x8x1xf32, #tpu.memory_space<vmem>>, vector<1x8x1xf32>
    %59 = vector.shape_cast %58 : vector<1x8x1xf32> to vector<8x1xf32>
    %cst_46 = arith.constant dense<0xFF800000> : vector<8xf32>
    %60 = vector.multi_reduction <maximumf>, %57, %cst_46 [1] : vector<8x8xf32> to vector<8xf32>
    %61 = vector.shape_cast %60 : vector<8xf32> to vector<8x1xf32>
    %62 = arith.maximumf %59, %61 : vector<8x1xf32>
    %63 = arith.subf %59, %62 : vector<8x1xf32>
    %64 = math.exp %63 : vector<8x1xf32>
    %65 = vector.broadcast %62 : vector<8x1xf32> to vector<8x8xf32>
    %66 = arith.subf %57, %65 : vector<8x8xf32>
    %67 = math.exp %66 : vector<8x8xf32>
    %c1_47 = arith.constant 1 : index
    %c0_48 = arith.constant 0 : index
    %c0_49 = arith.constant 0 : index
    %68 = vector.load %arg17[%c1_47, %c0_48, %c0_49] : memref<4x8x1xf32, #tpu.memory_space<vmem>>, vector<1x8x1xf32>
    %69 = vector.shape_cast %68 : vector<1x8x1xf32> to vector<8x1xf32>
    %70 = arith.mulf %64, %69 : vector<8x1xf32>
    %cst_50 = arith.constant dense<0.000000e+00> : vector<8xf32>
    %71 = vector.multi_reduction <add>, %67, %cst_50 [1] : vector<8x8xf32> to vector<8xf32>
    %72 = vector.shape_cast %71 : vector<8xf32> to vector<8x1xf32>
    %73 = arith.addf %70, %72 : vector<8x1xf32>
    %c1_51 = arith.constant 1 : index
    %c0_52 = arith.constant 0 : index
    %c0_53 = arith.constant 0 : index
    %74 = vector.load %arg17[%c1_51, %c0_52, %c0_53] : memref<4x8x1xf32, #tpu.memory_space<vmem>>, vector<1x8x1xf32>
    %75 = vector.shape_cast %74 : vector<1x8x1xf32> to vector<8x1xf32>
    %76 = vector.shape_cast %73 : vector<8x1xf32> to vector<1x8x1xf32>
    tpu.vector_store %arg17[%c1_51, %c0_52, %c0_53], %76 {strides = array<i32>} : memref<4x8x1xf32, #tpu.memory_space<vmem>>, vector<1x8x1xf32>,
    %c1_54 = arith.constant 1 : index
    %c0_55 = arith.constant 0 : index
    %c0_56 = arith.constant 0 : index
    %77 = vector.load %arg18[%c1_54, %c0_55, %c0_56] : memref<4x8x8xf32, #tpu.memory_space<vmem>>, vector<1x8x8xf32>
    %78 = vector.shape_cast %77 : vector<1x8x8xf32> to vector<8x8xf32>
    %79 = vector.broadcast %64 : vector<8x1xf32> to vector<8x8xf32>
    %80 = arith.mulf %79, %78 : vector<8x8xf32>
    %cst_57 = arith.constant dense<0.000000e+00> : vector<8x8xf32>
    %81 = tpu.matmul %67, %54, %cst_57 {dimension_numbers = #tpu.dot_dimension_numbers<[1], [0], [0], [1], [0, 0, 1, 1], [], []>} : vector<8x8xf32>, vector<8x8xf32>, vector<8x8xf32> -> vector<8x8xf32>
    %82 = arith.addf %80, %81 : vector<8x8xf32>
    %c1_58 = arith.constant 1 : index
    %c0_59 = arith.constant 0 : index
    %c0_60 = arith.constant 0 : index
    %83 = vector.load %arg18[%c1_58, %c0_59, %c0_60] : memref<4x8x8xf32, #tpu.memory_space<vmem>>, vector<1x8x8xf32>
    %84 = vector.shape_cast %83 : vector<1x8x8xf32> to vector<8x8xf32>
    %85 = vector.shape_cast %82 : vector<8x8xf32> to vector<1x8x8xf32>
    tpu.vector_store %arg18[%c1_58, %c0_59, %c0_60], %85 {strides = array<i32>} : memref<4x8x8xf32, #tpu.memory_space<vmem>>, vector<1x8x8xf32>,
    %c1_61 = arith.constant 1 : index
    %c0_62 = arith.constant 0 : index
    %c0_63 = arith.constant 0 : index
    %86 = vector.load %arg16[%c1_61, %c0_62, %c0_63] : memref<4x8x1xf32, #tpu.memory_space<vmem>>, vector<1x8x1xf32>
    %87 = vector.shape_cast %86 : vector<1x8x1xf32> to vector<8x1xf32>
    %88 = vector.shape_cast %62 : vector<8x1xf32> to vector<1x8x1xf32>
    tpu.vector_store %arg16[%c1_61, %c0_62, %c0_63], %88 {strides = array<i32>} : memref<4x8x1xf32, #tpu.memory_space<vmem>>, vector<1x8x1xf32>,
    %89 = vector.extract_strided_slice %9 {offsets = [0, 16], sizes = [8, 8], strides = [1, 1]} : vector<8x32xf32> to vector<8x8xf32>
    %90 = vector.extract_strided_slice %16 {offsets = [0, 16], sizes = [8, 8], strides = [1, 1]} : vector<8x32xf32> to vector<8x8xf32>
    %c2 = arith.constant 2 : index
    %c0_64 = arith.constant 0 : index
    %c0_65 = arith.constant 0 : index
    %91 = vector.load %arg15[%c2, %c0_64, %c0_65] : memref<4x8x8xf32, #tpu.memory_space<vmem>>, vector<1x8x8xf32>
    %92 = vector.shape_cast %91 : vector<1x8x8xf32> to vector<8x8xf32>
    %cst_66 = arith.constant dense<0.000000e+00> : vector<8x8xf32>
    %93 = tpu.matmul %92, %89, %cst_66 {dimension_numbers = #tpu.dot_dimension_numbers<[1], [1], [0], [0], [0, 0, 1, 0], [], []>} : vector<8x8xf32>, vector<8x8xf32>, vector<8x8xf32> -> vector<8x8xf32>
    %c2_67 = arith.constant 2 : index
    %c0_68 = arith.constant 0 : index
    %c0_69 = arith.constant 0 : index
    %94 = vector.load %arg16[%c2_67, %c0_68, %c0_69] : memref<4x8x1xf32, #tpu.memory_space<vmem>>, vector<1x8x1xf32>
    %95 = vector.shape_cast %94 : vector<1x8x1xf32> to vector<8x1xf32>
    %cst_70 = arith.constant dense<0xFF800000> : vector<8xf32>
    %96 = vector.multi_reduction <maximumf>, %93, %cst_70 [1] : vector<8x8xf32> to vector<8xf32>
    %97 = vector.shape_cast %96 : vector<8xf32> to vector<8x1xf32>
    %98 = arith.maximumf %95, %97 : vector<8x1xf32>
    %99 = arith.subf %95, %98 : vector<8x1xf32>
    %100 = math.exp %99 : vector<8x1xf32>
    %101 = vector.broadcast %98 : vector<8x1xf32> to vector<8x8xf32>
    %102 = arith.subf %93, %101 : vector<8x8xf32>
    %103 = math.exp %102 : vector<8x8xf32>
    %c2_71 = arith.constant 2 : index
    %c0_72 = arith.constant 0 : index
    %c0_73 = arith.constant 0 : index
    %104 = vector.load %arg17[%c2_71, %c0_72, %c0_73] : memref<4x8x1xf32, #tpu.memory_space<vmem>>, vector<1x8x1xf32>
    %105 = vector.shape_cast %104 : vector<1x8x1xf32> to vector<8x1xf32>
    %106 = arith.mulf %100, %105 : vector<8x1xf32>
    %cst_74 = arith.constant dense<0.000000e+00> : vector<8xf32>
    %107 = vector.multi_reduction <add>, %103, %cst_74 [1] : vector<8x8xf32> to vector<8xf32>
    %108 = vector.shape_cast %107 : vector<8xf32> to vector<8x1xf32>
    %109 = arith.addf %106, %108 : vector<8x1xf32>
    %c2_75 = arith.constant 2 : index
    %c0_76 = arith.constant 0 : index
    %c0_77 = arith.constant 0 : index
    %110 = vector.load %arg17[%c2_75, %c0_76, %c0_77] : memref<4x8x1xf32, #tpu.memory_space<vmem>>, vector<1x8x1xf32>
    %111 = vector.shape_cast %110 : vector<1x8x1xf32> to vector<8x1xf32>
    %112 = vector.shape_cast %109 : vector<8x1xf32> to vector<1x8x1xf32>
    tpu.vector_store %arg17[%c2_75, %c0_76, %c0_77], %112 {strides = array<i32>} : memref<4x8x1xf32, #tpu.memory_space<vmem>>, vector<1x8x1xf32>,
    %c2_78 = arith.constant 2 : index
    %c0_79 = arith.constant 0 : index
    %c0_80 = arith.constant 0 : index
    %113 = vector.load %arg18[%c2_78, %c0_79, %c0_80] : memref<4x8x8xf32, #tpu.memory_space<vmem>>, vector<1x8x8xf32>
    %114 = vector.shape_cast %113 : vector<1x8x8xf32> to vector<8x8xf32>
    %115 = vector.broadcast %100 : vector<8x1xf32> to vector<8x8xf32>
    %116 = arith.mulf %115, %114 : vector<8x8xf32>
    %cst_81 = arith.constant dense<0.000000e+00> : vector<8x8xf32>
    %117 = tpu.matmul %103, %90, %cst_81 {dimension_numbers = #tpu.dot_dimension_numbers<[1], [0], [0], [1], [0, 0, 1, 1], [], []>} : vector<8x8xf32>, vector<8x8xf32>, vector<8x8xf32> -> vector<8x8xf32>
    %118 = arith.addf %116, %117 : vector<8x8xf32>
    %c2_82 = arith.constant 2 : index
    %c0_83 = arith.constant 0 : index
    %c0_84 = arith.constant 0 : index
    %119 = vector.load %arg18[%c2_82, %c0_83, %c0_84] : memref<4x8x8xf32, #tpu.memory_space<vmem>>, vector<1x8x8xf32>
    %120 = vector.shape_cast %119 : vector<1x8x8xf32> to vector<8x8xf32>
    %121 = vector.shape_cast %118 : vector<8x8xf32> to vector<1x8x8xf32>
    tpu.vector_store %arg18[%c2_82, %c0_83, %c0_84], %121 {strides = array<i32>} : memref<4x8x8xf32, #tpu.memory_space<vmem>>, vector<1x8x8xf32>,
    %c2_85 = arith.constant 2 : index
    %c0_86 = arith.constant 0 : index
    %c0_87 = arith.constant 0 : index
    %122 = vector.load %arg16[%c2_85, %c0_86, %c0_87] : memref<4x8x1xf32, #tpu.memory_space<vmem>>, vector<1x8x1xf32>
    %123 = vector.shape_cast %122 : vector<1x8x1xf32> to vector<8x1xf32>
    %124 = vector.shape_cast %98 : vector<8x1xf32> to vector<1x8x1xf32>
    tpu.vector_store %arg16[%c2_85, %c0_86, %c0_87], %124 {strides = array<i32>} : memref<4x8x1xf32, #tpu.memory_space<vmem>>, vector<1x8x1xf32>,
    %125 = vector.extract_strided_slice %9 {offsets = [0, 24], sizes = [8, 8], strides = [1, 1]} : vector<8x32xf32> to vector<8x8xf32>
    %126 = vector.extract_strided_slice %16 {offsets = [0, 24], sizes = [8, 8], strides = [1, 1]} : vector<8x32xf32> to vector<8x8xf32>
    %c3 = arith.constant 3 : index
    %c0_88 = arith.constant 0 : index
    %c0_89 = arith.constant 0 : index
    %127 = vector.load %arg15[%c3, %c0_88, %c0_89] : memref<4x8x8xf32, #tpu.memory_space<vmem>>, vector<1x8x8xf32>
    %128 = vector.shape_cast %127 : vector<1x8x8xf32> to vector<8x8xf32>
    %cst_90 = arith.constant dense<0.000000e+00> : vector<8x8xf32>
    %129 = tpu.matmul %128, %125, %cst_90 {dimension_numbers = #tpu.dot_dimension_numbers<[1], [1], [0], [0], [0, 0, 1, 0], [], []>} : vector<8x8xf32>, vector<8x8xf32>, vector<8x8xf32> -> vector<8x8xf32>
    %c3_91 = arith.constant 3 : index
    %c0_92 = arith.constant 0 : index
    %c0_93 = arith.constant 0 : index
    %130 = vector.load %arg16[%c3_91, %c0_92, %c0_93] : memref<4x8x1xf32, #tpu.memory_space<vmem>>, vector<1x8x1xf32>
    %131 = vector.shape_cast %130 : vector<1x8x1xf32> to vector<8x1xf32>
    %cst_94 = arith.constant dense<0xFF800000> : vector<8xf32>
    %132 = vector.multi_reduction <maximumf>, %129, %cst_94 [1] : vector<8x8xf32> to vector<8xf32>
    %133 = vector.shape_cast %132 : vector<8xf32> to vector<8x1xf32>
    %134 = arith.maximumf %131, %133 : vector<8x1xf32>
    %135 = arith.subf %131, %134 : vector<8x1xf32>
    %136 = math.exp %135 : vector<8x1xf32>
    %137 = vector.broadcast %134 : vector<8x1xf32> to vector<8x8xf32>
    %138 = arith.subf %129, %137 : vector<8x8xf32>
    %139 = math.exp %138 : vector<8x8xf32>
    %c3_95 = arith.constant 3 : index
    %c0_96 = arith.constant 0 : index
    %c0_97 = arith.constant 0 : index
    %140 = vector.load %arg17[%c3_95, %c0_96, %c0_97] : memref<4x8x1xf32, #tpu.memory_space<vmem>>, vector<1x8x1xf32>
    %141 = vector.shape_cast %140 : vector<1x8x1xf32> to vector<8x1xf32>
    %142 = arith.mulf %136, %141 : vector<8x1xf32>
    %cst_98 = arith.constant dense<0.000000e+00> : vector<8xf32>
    %143 = vector.multi_reduction <add>, %139, %cst_98 [1] : vector<8x8xf32> to vector<8xf32>
    %144 = vector.shape_cast %143 : vector<8xf32> to vector<8x1xf32>
    %145 = arith.addf %142, %144 : vector<8x1xf32>
    %c3_99 = arith.constant 3 : index
    %c0_100 = arith.constant 0 : index
    %c0_101 = arith.constant 0 : index
    %146 = vector.load %arg17[%c3_99, %c0_100, %c0_101] : memref<4x8x1xf32, #tpu.memory_space<vmem>>, vector<1x8x1xf32>
    %147 = vector.shape_cast %146 : vector<1x8x1xf32> to vector<8x1xf32>
    %148 = vector.shape_cast %145 : vector<8x1xf32> to vector<1x8x1xf32>
    tpu.vector_store %arg17[%c3_99, %c0_100, %c0_101], %148 {strides = array<i32>} : memref<4x8x1xf32, #tpu.memory_space<vmem>>, vector<1x8x1xf32>,
    %c3_102 = arith.constant 3 : index
    %c0_103 = arith.constant 0 : index
    %c0_104 = arith.constant 0 : index
    %149 = vector.load %arg18[%c3_102, %c0_103, %c0_104] : memref<4x8x8xf32, #tpu.memory_space<vmem>>, vector<1x8x8xf32>
    %150 = vector.shape_cast %149 : vector<1x8x8xf32> to vector<8x8xf32>
    %151 = vector.broadcast %136 : vector<8x1xf32> to vector<8x8xf32>
    %152 = arith.mulf %151, %150 : vector<8x8xf32>
    %cst_105 = arith.constant dense<0.000000e+00> : vector<8x8xf32>
    %153 = tpu.matmul %139, %126, %cst_105 {dimension_numbers = #tpu.dot_dimension_numbers<[1], [0], [0], [1], [0, 0, 1, 1], [], []>} : vector<8x8xf32>, vector<8x8xf32>, vector<8x8xf32> -> vector<8x8xf32>
    %154 = arith.addf %152, %153 : vector<8x8xf32>
    %c3_106 = arith.constant 3 : index
    %c0_107 = arith.constant 0 : index
    %c0_108 = arith.constant 0 : index
    %155 = vector.load %arg18[%c3_106, %c0_107, %c0_108] : memref<4x8x8xf32, #tpu.memory_space<vmem>>, vector<1x8x8xf32>
    %156 = vector.shape_cast %155 : vector<1x8x8xf32> to vector<8x8xf32>
    %157 = vector.shape_cast %154 : vector<8x8xf32> to vector<1x8x8xf32>
    tpu.vector_store %arg18[%c3_106, %c0_107, %c0_108], %157 {strides = array<i32>} : memref<4x8x8xf32, #tpu.memory_space<vmem>>, vector<1x8x8xf32>,
    %c3_109 = arith.constant 3 : index
    %c0_110 = arith.constant 0 : index
    %c0_111 = arith.constant 0 : index
    %158 = vector.load %arg16[%c3_109, %c0_110, %c0_111] : memref<4x8x1xf32, #tpu.memory_space<vmem>>, vector<1x8x1xf32>
    %159 = vector.shape_cast %158 : vector<1x8x1xf32> to vector<8x1xf32>
    %160 = vector.shape_cast %134 : vector<8x1xf32> to vector<1x8x1xf32>
    tpu.vector_store %arg16[%c3_109, %c0_110, %c0_111], %160 {strides = array<i32>} : memref<4x8x1xf32, #tpu.memory_space<vmem>>, vector<1x8x1xf32>,
    %c0_i32_112 = arith.constant 0 : i32
    %161 = arith.cmpi eq, %arg2, %c0_i32_112 : i32
    %162 = arith.extui %161 : i1 to i32
    %c0_i32_113 = arith.constant 0 : i32
    %163 = arith.cmpi ne, %162, %c0_i32_113 : i32
    scf.if %163 {
      %c0_114 = arith.constant 0 : index
      %c0_115 = arith.constant 0 : index
      %c0_116 = arith.constant 0 : index
      %164 = vector.load %arg18[%c0_114, %c0_115, %c0_116] : memref<4x8x8xf32, #tpu.memory_space<vmem>>, vector<1x8x8xf32>
      %165 = vector.shape_cast %164 : vector<1x8x8xf32> to vector<8x8xf32>
      %c0_117 = arith.constant 0 : index
      %c0_118 = arith.constant 0 : index
      %c0_119 = arith.constant 0 : index
      %166 = vector.load %arg17[%c0_117, %c0_118, %c0_119] : memref<4x8x1xf32, #tpu.memory_space<vmem>>, vector<1x8x1xf32>
      %167 = vector.shape_cast %166 : vector<1x8x1xf32> to vector<8x1xf32>
      %168 = tpu.reciprocal %167 {approx = true} : vector<8x1xf32> -> vector<8x1xf32>
      %169 = vector.broadcast %168 : vector<8x1xf32> to vector<8x8xf32>
      %170 = arith.mulf %165, %169 : vector<8x8xf32>
      %c0_120 = arith.constant 0 : index
      %c0_121 = arith.constant 0 : index
      %c0_122 = arith.constant 0 : index
      %171 = vector.load %arg12[%c0_120, %c0_121, %c0_122] : memref<4x8x32xf32, #tpu.memory_space<vmem>>, vector<1x8x32xf32>
      %172 = vector.shape_cast %171 : vector<1x8x32xf32> to vector<8x32xf32>
      %cst_123 = arith.constant dense<0.000000e+00> : vector<8x32xf32>
      %173 = tpu.matmul %170, %172, %cst_123 {dimension_numbers = #tpu.dot_dimension_numbers<[1], [0], [0], [1], [0, 0, 1, 1], [], []>} : vector<8x8xf32>, vector<8x32xf32>, vector<8x32xf32> -> vector<8x32xf32>
      %c1_124 = arith.constant 1 : index
      %c0_125 = arith.constant 0 : index
      %c0_126 = arith.constant 0 : index
      %174 = vector.load %arg18[%c1_124, %c0_125, %c0_126] : memref<4x8x8xf32, #tpu.memory_space<vmem>>, vector<1x8x8xf32>
      %175 = vector.shape_cast %174 : vector<1x8x8xf32> to vector<8x8xf32>
      %c1_127 = arith.constant 1 : index
      %c0_128 = arith.constant 0 : index
      %c0_129 = arith.constant 0 : index
      %176 = vector.load %arg17[%c1_127, %c0_128, %c0_129] : memref<4x8x1xf32, #tpu.memory_space<vmem>>, vector<1x8x1xf32>
      %177 = vector.shape_cast %176 : vector<1x8x1xf32> to vector<8x1xf32>
      %178 = tpu.reciprocal %177 {approx = true} : vector<8x1xf32> -> vector<8x1xf32>
      %179 = vector.broadcast %178 : vector<8x1xf32> to vector<8x8xf32>
      %180 = arith.mulf %175, %179 : vector<8x8xf32>
      %c1_130 = arith.constant 1 : index
      %c0_131 = arith.constant 0 : index
      %c0_132 = arith.constant 0 : index
      %181 = vector.load %arg12[%c1_130, %c0_131, %c0_132] : memref<4x8x32xf32, #tpu.memory_space<vmem>>, vector<1x8x32xf32>
      %182 = vector.shape_cast %181 : vector<1x8x32xf32> to vector<8x32xf32>
      %cst_133 = arith.constant dense<0.000000e+00> : vector<8x32xf32>
      %183 = tpu.matmul %180, %182, %cst_133 {dimension_numbers = #tpu.dot_dimension_numbers<[1], [0], [0], [1], [0, 0, 1, 1], [], []>} : vector<8x8xf32>, vector<8x32xf32>, vector<8x32xf32> -> vector<8x32xf32>
      %184 = arith.addf %173, %183 : vector<8x32xf32>
      %c2_134 = arith.constant 2 : index
      %c0_135 = arith.constant 0 : index
      %c0_136 = arith.constant 0 : index
      %185 = vector.load %arg18[%c2_134, %c0_135, %c0_136] : memref<4x8x8xf32, #tpu.memory_space<vmem>>, vector<1x8x8xf32>
      %186 = vector.shape_cast %185 : vector<1x8x8xf32> to vector<8x8xf32>
      %c2_137 = arith.constant 2 : index
      %c0_138 = arith.constant 0 : index
      %c0_139 = arith.constant 0 : index
      %187 = vector.load %arg17[%c2_137, %c0_138, %c0_139] : memref<4x8x1xf32, #tpu.memory_space<vmem>>, vector<1x8x1xf32>
      %188 = vector.shape_cast %187 : vector<1x8x1xf32> to vector<8x1xf32>
      %189 = tpu.reciprocal %188 {approx = true} : vector<8x1xf32> -> vector<8x1xf32>
      %190 = vector.broadcast %189 : vector<8x1xf32> to vector<8x8xf32>
      %191 = arith.mulf %186, %190 : vector<8x8xf32>
      %c2_140 = arith.constant 2 : index
      %c0_141 = arith.constant 0 : index
      %c0_142 = arith.constant 0 : index
      %192 = vector.load %arg12[%c2_140, %c0_141, %c0_142] : memref<4x8x32xf32, #tpu.memory_space<vmem>>, vector<1x8x32xf32>
      %193 = vector.shape_cast %192 : vector<1x8x32xf32> to vector<8x32xf32>
      %cst_143 = arith.constant dense<0.000000e+00> : vector<8x32xf32>
      %194 = tpu.matmul %191, %193, %cst_143 {dimension_numbers = #tpu.dot_dimension_numbers<[1], [0], [0], [1], [0, 0, 1, 1], [], []>} : vector<8x8xf32>, vector<8x32xf32>, vector<8x32xf32> -> vector<8x32xf32>
      %195 = arith.addf %184, %194 : vector<8x32xf32>
      %c3_144 = arith.constant 3 : index
      %c0_145 = arith.constant 0 : index
      %c0_146 = arith.constant 0 : index
      %196 = vector.load %arg18[%c3_144, %c0_145, %c0_146] : memref<4x8x8xf32, #tpu.memory_space<vmem>>, vector<1x8x8xf32>
      %197 = vector.shape_cast %196 : vector<1x8x8xf32> to vector<8x8xf32>
      %c3_147 = arith.constant 3 : index
      %c0_148 = arith.constant 0 : index
      %c0_149 = arith.constant 0 : index
      %198 = vector.load %arg17[%c3_147, %c0_148, %c0_149] : memref<4x8x1xf32, #tpu.memory_space<vmem>>, vector<1x8x1xf32>
      %199 = vector.shape_cast %198 : vector<1x8x1xf32> to vector<8x1xf32>
      %200 = tpu.reciprocal %199 {approx = true} : vector<8x1xf32> -> vector<8x1xf32>
      %201 = vector.broadcast %200 : vector<8x1xf32> to vector<8x8xf32>
      %202 = arith.mulf %197, %201 : vector<8x8xf32>
      %c3_150 = arith.constant 3 : index
      %c0_151 = arith.constant 0 : index
      %c0_152 = arith.constant 0 : index
      %203 = vector.load %arg12[%c3_150, %c0_151, %c0_152] : memref<4x8x32xf32, #tpu.memory_space<vmem>>, vector<1x8x32xf32>
      %204 = vector.shape_cast %203 : vector<1x8x32xf32> to vector<8x32xf32>
      %cst_153 = arith.constant dense<0.000000e+00> : vector<8x32xf32>
      %205 = tpu.matmul %202, %204, %cst_153 {dimension_numbers = #tpu.dot_dimension_numbers<[1], [0], [0], [1], [0, 0, 1, 1], [], []>} : vector<8x8xf32>, vector<8x32xf32>, vector<8x32xf32> -> vector<8x32xf32>
      %206 = arith.addf %195, %205 : vector<8x32xf32>
      %c0_154 = arith.constant 0 : index
      %c0_155 = arith.constant 0 : index
      %207 = vector.load %arg13[%c0_154, %c0_155] : memref<1x32xf32, #tpu.memory_space<vmem>>, vector<1x32xf32>
      %208 = vector.broadcast %207 : vector<1x32xf32> to vector<8x32xf32>
      %209 = arith.addf %206, %208 : vector<8x32xf32>
      %c0_156 = arith.constant 0 : index
      %c0_157 = arith.constant 0 : index
      %c0_158 = arith.constant 0 : index
      %210 = vector.load %arg14[%c0_156, %c0_157, %c0_158] : memref<1x8x32xf32, #tpu.memory_space<vmem>>, vector<1x8x32xf32>
      %211 = vector.shape_cast %210 : vector<1x8x32xf32> to vector<8x32xf32>
      %212 = vector.shape_cast %209 : vector<8x32xf32> to vector<1x8x32xf32>
      tpu.vector_store %arg14[%c0_156, %c0_157, %c0_158], %212 {strides = array<i32>} : memref<1x8x32xf32, #tpu.memory_space<vmem>>, vector<1x8x32xf32>,
    } else {
    }
    return
  }
  func.func @transform_0(%arg0: i32, %arg1: i32, %arg2: i32) -> (i32, i32, i32) {
    %c0_i32 = arith.constant 0 : i32
    %c0_i32_0 = arith.constant 0 : i32
    return %arg0, %arg1, %c0_i32 : i32, i32, i32
  }
  func.func @transform_1(%arg0: i32, %arg1: i32, %arg2: i32) -> (i32, i32, i32) {
    %c0_i32 = arith.constant 0 : i32
    %c0_i32_0 = arith.constant 0 : i32
    return %arg0, %arg2, %c0_i32 : i32, i32, i32
  }
  func.func @transform_2(%arg0: i32, %arg1: i32, %arg2: i32) -> (i32, i32, i32) {
    %c0_i32 = arith.constant 0 : i32
    %c0_i32_0 = arith.constant 0 : i32
    return %arg0, %arg2, %c0_i32 : i32, i32, i32
  }
  func.func @transform_3(%arg0: i32, %arg1: i32, %arg2: i32) -> (i32, i32) {
    %c0_i32 = arith.constant 0 : i32
    %c0_i32_0 = arith.constant 0 : i32
    %c0_i32_1 = arith.constant 0 : i32
    return %c0_i32, %c0_i32_0 : i32, i32
  }
  func.func @transform_4(%arg0: i32, %arg1: i32, %arg2: i32) -> (i32, i32) {
    %c0_i32 = arith.constant 0 : i32
    %c0_i32_0 = arith.constant 0 : i32
    %c0_i32_1 = arith.constant 0 : i32
    return %c0_i32, %c0_i32_0 : i32, i32
  }
  func.func @transform_5(%arg0: i32, %arg1: i32, %arg2: i32) -> (i32, i32) {
    %c0_i32 = arith.constant 0 : i32
    %c0_i32_0 = arith.constant 0 : i32
    %c0_i32_1 = arith.constant 0 : i32
    return %c0_i32, %c0_i32_0 : i32, i32
  }
  func.func @transform_6(%arg0: i32, %arg1: i32, %arg2: i32) -> (i32, i32) {
    %c0_i32 = arith.constant 0 : i32
    %c0_i32_0 = arith.constant 0 : i32
    %c0_i32_1 = arith.constant 0 : i32
    return %c0_i32, %c0_i32_0 : i32, i32
  }
  func.func @transform_7(%arg0: i32, %arg1: i32, %arg2: i32) -> (i32, i32) {
    %c0_i32 = arith.constant 0 : i32
    %c0_i32_0 = arith.constant 0 : i32
    %c0_i32_1 = arith.constant 0 : i32
    return %c0_i32, %c0_i32_0 : i32, i32
  }
  func.func @transform_8(%arg0: i32, %arg1: i32, %arg2: i32) -> (i32, i32) {
    %c0_i32 = arith.constant 0 : i32
    %c0_i32_0 = arith.constant 0 : i32
    %c0_i32_1 = arith.constant 0 : i32
    return %c0_i32, %c0_i32_0 : i32, i32
  }
  func.func @transform_9(%arg0: i32, %arg1: i32, %arg2: i32) -> (i32, i32, i32) {
    %c0_i32 = arith.constant 0 : i32
    %c0_i32_0 = arith.constant 0 : i32
    %c0_i32_1 = arith.constant 0 : i32
    %c0_i32_2 = arith.constant 0 : i32
    return %c0_i32, %c0_i32_0, %c0_i32_1 : i32, i32, i32
  }
  func.func @transform_10(%arg0: i32, %arg1: i32, %arg2: i32) -> (i32, i32) {
    %c0_i32 = arith.constant 0 : i32
    %c0_i32_0 = arith.constant 0 : i32
    %c0_i32_1 = arith.constant 0 : i32
    return %c0_i32, %c0_i32_0 : i32, i32
  }
  func.func @transform_11(%arg0: i32, %arg1: i32, %arg2: i32) -> (i32, i32, i32) {
    %c0_i32 = arith.constant 0 : i32
    %c0_i32_0 = arith.constant 0 : i32
    return %arg0, %arg1, %c0_i32 : i32, i32, i32
  }
}

</mosaic_0001>

<bundles_post_ra>
// kernel: tpu_custom_call.1
= control target key start
LH: loop header
LB: loop body
LE: loop exit
PB: predicated region body
PF: predicated region fallthrough
CT: control target
= control target key end

     0   :  { %s3266_s0 = inlined_call_operand.hbm [shape: f32[2,8,32], index: 0, kind: input, shape index: {}]   ;;  %s3267_s1 = inlined_call_operand.hbm [shape: f32[2,8,32], index: 1, kind: input, shape index: {}]   ;;  %s3268_s2 = inlined_call_operand.hbm [shape: f32[2,8,32], index: 2, kind: input, shape index: {}]   ;;  %s3269_s3 = inlined_call_operand.hbm [shape: f32[32,32], index: 3, kind: input, shape index: {}]   ;;  %s3270_s4 = inlined_call_operand.vmem [shape: f32[1,32], index: 4, kind: input, shape index: {}]   ;;  %s3271_s5 = inlined_call_operand.hbm [shape: f32[32,32], index: 5, kind: input, shape index: {}]   ;;  %s3272_s6 = inlined_call_operand.vmem [shape: f32[1,32], index: 6, kind: input, shape index: {}]   ;;  %s3273_s7 = inlined_call_operand.hbm [shape: f32[32,32], index: 7, kind: input, shape index: {}]   ;;  %s3274_s8 = inlined_call_operand.vmem [shape: f32[1,32], index: 8, kind: input, shape index: {}]   ;;  %s3275_s9 = inlined_call_operand.hbm [shape: f32[4,8,32], index: 9, kind: input, shape index: {}]   ;;  %s3276_s10 = inlined_call_operand.vmem [shape: f32[1,32], index: 10, kind: input, shape index: {}]   ;;  %s3277_s11 = inlined_call_operand.hbm [shape: f32[2,8,32], index: 11, kind: output, shape index: {}]  }
   0x1   :  { %3296 = sst [smem:[#allocation31_spill]] %s3267_s1 }
   0x2   :  { %3297 = sst [smem:[#allocation32_spill]] %s3269_s3 }
   0x3   :  { %3298 = sst [smem:[#allocation33_spill]] %s3271_s5 }
   0x4   :  { %3299 = sst [smem:[#allocation34_spill]] %s3273_s7 }
   0x5   :  { %3300 = sst [smem:[#allocation35_spill]] %s3276_s10 }
   0x6   :  { %3301 = sst [smem:[#allocation36_spill]] %s3277_s11 }
   0x7   :  { %16 = vsyncpa [#allocation7], 0 }
   0x8   :  { %18 = vsyncpa [#allocation7 + $0x1], 0 }
   0x9   :  { %19 = vsyncpa [#allocation10], 0 }
   0xa   :  { %21 = vsyncpa [#allocation10 + $0x1], 0 }
   0xb   :  { %22 = vsyncpa [#allocation13], 0 }
   0xc   :  { %23 = vsyncpa [#allocation16], 0 }
   0xd   :  { %24 = vsyncpa [#allocation8], 0 }
   0xe   :  { %26 = vsyncpa [#allocation8 + $0x1], 0  ;;  %s2831_s17 = smov 0   ;;  %s2833_s18 = smov 0  }
   0xf   :  { %s2835_s19 = smov 0   ;;  %s2837_s20 = smov 0  }
  0x10   :  { %s2839_s21 = smov 0   ;;  %s2841_s22 = smov 0  }
  0x11 LB: > { %3302 = sst [smem:[#allocation24_spill]] %s2732_s17  ;;  %s2862_s23 = sadd.s32 4294967295, %s2752_s22   ;;  %s2752_s22 = sphi %s2841_s22, %s32_s22   ;;  %s2748_s21 = sphi %s2839_s21, %s3343_s21   ;;  %s2744_s20 = sphi %s2837_s20, %s3342_s20   ;;  %s2740_s19 = sphi %s2835_s19, %s3346_s19   ;;  %s2736_s18 = sphi %s2833_s18, %s3345_s18   ;;  %s2732_s17 = sphi %s2831_s17, %s3344_s17  }
  0x12   : > { %3303 = sst [smem:[#allocation25_spill]] %s2748_s21  ;;  %p2144_p0 = scmp.ge.s32.totalorder %s2752_s22, 1 }
  0x13   : > { %3304 = sst [smem:[#allocation26_spill]] %s2752_s22  ;;  %p3290_p1 = scmp.eq.s32.totalorder %s2862_s23, 0 }
  0x14   : > { %p336_p2 = scmp.lt.s32.totalorder %s2752_s22, 3  ;;  %s2754_s25 = smov [#allocation12]  }
  0x15   : > { %s348_s26 = sshll.u32 %s2754_s25, 4  ;;  %s2755_s28 = smov [#allocation15]   ;;  %s349_s26 = int_to_ptr.vmem [resolvable:$true] %s348_s26 }
  0x16   : > { %p2867_p3 = pnand %p2144_p0, %p336_p2  ;;  %s380_s29 = sshll.u32 %s2755_s28, 4  ;;  %s381_s29 = int_to_ptr.vmem [resolvable:$true] %s380_s29 }
  0x17   : > { %s2483_s30 = scalar_lea.vmem %s349_s26, 512  ;;  %p2491_p11 = scmp.lt.s32.totalorder %s349_s26, %s349_s26 }
  0x18   : > { %p2348_p4 = pneg %p2867_p3  ;;  %p2484_p8 = scmp.ne.s32.totalorder %s349_s26, %s2483_s30 }
  0x19   : > { %p2492_p12 = scmp.lt.s32.totalorder %s2483_s30, %s2483_s30 }
  0x1a   : > { %p2876_p6 = pnand %p2348_p4, %p3290_p1 }
  0x1b   : > { %p2493_p13 = por %p2492_p12, %p2491_p11 }
  0x1c   : > { %p3291_p7 = pneg %p2876_p6 }
  0x1e   : > { %p2486_p9 = pnand %p2484_p8, %p3291_p7 }
  0x20   : > { %p2487_p10 = pneg %p2486_p9 }
  0x22   : > { %p2494_p0 = pnand %p2493_p13, %p2487_p10 }
  0x24   : > { %2497 = shalt.err (!%p2494_p0)
}
  0x25   : > { %s3278_s12 = smov 128   ;;  %s3280_s13 = smov 8  }
  0x26   : > { %s3307_s3 = sld [smem:[#allocation32_spill]]  ;;  %s2509_s16 = scalar_lea.vmem %s381_s29, 512 }
  0x27   : > { %p2510_p2 = scmp.ne.s32.totalorder %s381_s29, %s2509_s16  ;;  %p2517_p9 = scmp.lt.s32.totalorder %s381_s29, %s381_s29 }
  0x28   : > { %p2518_p10 = scmp.lt.s32.totalorder %s2509_s16, %s2509_s16 }
  0x29   : > { %p2512_p4 = pnand %p2510_p2, %p3291_p7 }
  0x2a   : > { %p2519_p11 = por %p2518_p10, %p2517_p9 }
  0x2b   : > { %p2513_p8 = pneg %p2512_p4 }
  0x2c   : > { %2351 = dma.hbm_to_vmem [thread:$0]  (!%p2876_p6), %s3307_s3, 512, %s349_s26, [#allocation13], %s3278_s12, %s3278_s12, %s3280_s13  }
  0x2d   : > { %p2520_p12 = pnand %p2519_p11, %p2513_p8 }
  0x2f   : > { %2523 = shalt.err (!%p2520_p12)
}
  0x30   : > { %s3308_s7 = sld [smem:[#allocation34_spill]]  ;;  %s2143_s26 = sadd.s32 4294967294, %s2752_s22  }
  0x31   : > { %s51_s30 = sadd.s32 1, %s2748_s21  ;;  %s60_s14 = sadd.s32 1, %s2740_s19 }
  0x32   : > { %p53_p13 = scmp.ge.s32.totalorder %s51_s30, 2  ;;  %p67_p0 = scmp.ne.s32.totalorder %s2740_s19, %s2736_s18 }
  0x33   : > { %p68_p2 = scmp.eq.s32.totalorder %s2752_s22, 0  ;;  %p73_p8 = scmp.ne.s32.totalorder %s2736_s18, %s2732_s17 }
  0x34   : > { %s3348_s30 = smov (%p53_p13, %s51_s30), 0  ;;  %p323_p9 = scmp.eq.s32.totalorder %s2862_s23, 1 }
  0x35   : > { %3309 = sst [smem:[#allocation27_spill]] %s3348_s30  ;;  %p2912_p4 = por %p68_p2, %p67_p0 }
  0x36   : > { %2357 = dma.hbm_to_vmem [thread:$0]  (!%p2876_p6), %s3308_s7, 512, %s381_s29, [#allocation16], %s3278_s12, %s3278_s12, %s3280_s13  }
  0x37   : > { %s55_s29 = ssub.s32 %s2748_s21, %s3348_s30  ;;  %p2923_p11 = por %p3290_p1, %p73_p8 }
  0x38   : > { %p58_p10 = scmp.eq.s32.totalorder %s55_s29, 0  ;;  %p2927_p12 = por %p323_p9, %p67_p0 }
  0x39   : > { %p329_p13 = scmp.eq.s32.totalorder %s2143_s26, 1  ;;  %p2379_p5 = scmp.lt.s32.totalorder %s2752_s22, 2 }
  0x3a   : > { %s3312_s25 = scalar_select %p2927_p12, 1, 0 }
  0x3b   : > { %s2932_s28 = scalar_select %p58_p10, %s2740_s19, %s60_s14  }
  0x3c   : > { %3313 = sst [smem:[#allocation28_spill]] %s3312_s25  ;;  %p2934_p2 = por %p329_p13, %p73_p8 }
  0x3d   : > { %3314 = sst [smem:[#allocation29_spill]] %s2932_s28  ;;  %s3286_s13 = sand.u32 1, %s2740_s19  }
  0x3e   : > { %s3315_s12 = scalar_select %p2934_p2, 1, 0 }
  0x3f   : > { %s2941_s3 = sshll.u32 %s2748_s21, 7  ;;  %s2945_s29 = sshll.u32 %s3286_s13, 3 }
  0x40   : > { %3316 = sst [smem:[#allocation30_spill]] %s3315_s12  ;;  %p2949_p0 = pnand %p2379_p5, %p2912_p4 }
  0x41   : > { %s432_s26 = sand.u32 1, %s2752_s22   ;;  %s3318_s1 = sld [smem:[#allocation31_spill]] }
  0x42   : > { %s436_s12 = scalar_lea.vmem [#allocation9], %s2945_s29  ;;  %s2959_s17 = scalar_lea.sflag [#allocation10], %s432_s26 }
  0x43   : > { %s444_s21 = sshll.u32 %s436_s12, 4  ;;  %p3292_p8 = pneg %p2949_p0  ;;  %s445_s21 = int_to_ptr.vmem [resolvable:$true] %s444_s21 }
  0x44   : > { %s2537_s15 = scalar_lea.vmem %s445_s21, 128  ;;  %s2758_s13 = smov [#allocation9]  }
  0x45   : > { %p2538_p9 = scmp.ne.s32.totalorder %s445_s21, %s2537_s15  ;;  %s2542_s11 = sshll.u32 %s2758_s13, 4  ;;  %s2543_s11 = int_to_ptr.vmem [resolvable:$false] %s2542_s11 }
  0x46   : > { %s2544_s22 = scalar_lea.vmem %s2543_s11, 256  ;;  %p2545_p10 = scmp.lt.s32.totalorder %s445_s21, %s2543_s11 }
  0x47   : > { %s442_s28 = scalar_lea.hbm %s3318_s1, %s2941_s3  ;;  %p2540_p5 = pnand %p2538_p9, %p3292_p8 }
  0x48   : > { %p2546_p13 = scmp.lt.s32.totalorder %s2544_s22, %s2537_s15 }
  0x49   : > { %p2541_p4 = pneg %p2540_p5 }
  0x4a   : > { %p2547_p1 = por %p2546_p13, %p2545_p10 }
  0x4c   : > { %p2548_p7 = pnand %p2547_p1, %p2541_p4 }
  0x4e   : > { %2551 = shalt.err (!%p2548_p7)
}
  0x4f   : > { %2367 = dma.hbm_to_vmem [thread:$0]  (!%p2949_p0), %s442_s28, 128, %s445_s21, %s2959_s17  }
  0x50   : > { %s2759_s12 = smov [#allocation14]   ;;  %s2760_s26 = smov [#allocation17]  }
  0x51   : > { %s364_s30 = sshll.u32 %s2759_s12, 4  ;;  %s396_s14 = sshll.u32 %s2760_s26, 4  ;;  %s365_s30 = int_to_ptr.vmem [resolvable:$true] %s364_s30  ;;  %s397_s14 = int_to_ptr.vmem [resolvable:$true] %s396_s14 }
  0x52   : > { %s2563_s1 = scalar_lea.vmem %s365_s30, 512  ;;  %p3319_p5 = pneg %p2876_p6 }
  0x53   : > { %p2564_p9 = scmp.ne.s32.totalorder %s365_s30, %s2563_s1  ;;  %p2571_p12 = scmp.lt.s32.totalorder %s365_s30, %s365_s30 }
  0x54   : > { %p2572_p10 = scmp.lt.s32.totalorder %s2563_s1, %s2563_s1 }
  0x55   : > { %p2566_p8 = pnand %p2564_p9, %p3319_p5 }
  0x56   : > { %p2573_p1 = por %p2572_p10, %p2571_p12 }
  0x57   : > { %p2567_p2 = pneg %p2566_p8 }
  0x59   : > { %p2574_p7 = pnand %p2573_p1, %p2567_p2 }
  0x5b   : > { %2577 = shalt.err (!%p2574_p7)
}
  0x5c   : > { %s3320_s11 = smov 8   ;;  %s3321_s21 = smov 128  }
  0x5d   : > { %s3322_s5 = sld [smem:[#allocation33_spill]]  ;;  %s2589_s28 = scalar_lea.vmem %s397_s14, 512 }
  0x5e   : > { %p2590_p4 = scmp.ne.s32.totalorder %s397_s14, %s2589_s28  ;;  %p3323_p8 = pmov %p3319_p5 }
  0x5f   : > { %p2597_p12 = scmp.lt.s32.totalorder %s397_s14, %s397_s14  ;;  %p2598_p2 = scmp.lt.s32.totalorder %s2589_s28, %s2589_s28 }
  0x60   : > { %p2592_p13 = pnand %p2590_p4, %p3323_p8 }
  0x61   : > { %p2599_p5 = por %p2598_p2, %p2597_p12 }
  0x62   : > { %p2593_p9 = pneg %p2592_p13 }
  0x63   : > { %2354 = dma.hbm_to_vmem [thread:$0]  (!%p2876_p6), %s3322_s5, 512, %s365_s30, [#allocation13], %s3321_s21, %s3321_s21, %s3320_s11  }
  0x64   : > { %p2600_p10 = pnand %p2599_p5, %p2593_p9 }
  0x66   : > { %2603 = shalt.err (!%p2600_p10)
}
  0x67   : > { %2360 = dma.hbm_to_vmem [thread:$0]  (!%p2876_p6), %s3275_s9, 512, %s397_s14, [#allocation16], %s3321_s21, %s3321_s21, %s3320_s11  }
  0x68   : > { %s423_s26 = scalar_lea.hbm %s3266_s0, %s2941_s3  ;;  %s417_s22 = scalar_lea.vmem [#allocation6], %s2945_s29 }
  0x69   : > { %s425_s13 = sshll.u32 %s417_s22, 4  ;;  %s461_s5 = scalar_lea.hbm %s3268_s2, %s2941_s3  ;;  %s426_s13 = int_to_ptr.vmem [resolvable:$true] %s425_s13 }
  0x6a   : > { %s3324_s10 = sand.u32 1, %s2740_s19   ;;  %s2617_s1 = scalar_lea.vmem %s426_s13, 128 }
  0x6b   : > { %s414_s25 = scalar_lea.sflag [#allocation7], %s3324_s10  ;;  %p2618_p1 = scmp.ne.s32.totalorder %s426_s13, %s2617_s1 }
  0x6c   : > { %p3325_p7 = pneg %p2949_p0  ;;  %s2761_s14 = smov [#allocation6]  }
  0x6d   : > { %s2622_s11 = sshll.u32 %s2761_s14, 4  ;;  %s2623_s11 = int_to_ptr.vmem [resolvable:$false] %s2622_s11 }
  0x6e   : > { %p2620_p4 = pnand %p2618_p1, %p3325_p7  ;;  %s2624_s21 = scalar_lea.vmem %s2623_s11, 256 }
  0x6f   : > { %p2625_p6 = scmp.lt.s32.totalorder %s426_s13, %s2623_s11  ;;  %p2626_p13 = scmp.lt.s32.totalorder %s2624_s21, %s2617_s1 }
  0x70   : > { %p2621_p8 = pneg %p2620_p4 }
  0x71   : > { %p2627_p9 = por %p2626_p13, %p2625_p6 }
  0x73   : > { %p2628_p12 = pnand %p2627_p9, %p2621_p8 }
  0x75   : > { %2631 = shalt.err (!%p2628_p12)
}
  0x76   : > { %2364 = dma.hbm_to_vmem [thread:$0]  (!%p2949_p0), %s423_s26, 128, %s426_s13, %s414_s25  }
  0x77   : > { %s455_s10 = scalar_lea.vmem [#allocation11], %s2945_s29  ;;  %p3326_p5 = pmov %p3325_p7 }
  0x78   : > { %s463_s15 = sshll.u32 %s455_s10, 4  ;;  %s2762_s30 = smov [#allocation11]   ;;  %s464_s15 = int_to_ptr.vmem [resolvable:$true] %s463_s15 }
  0x79   : > { %s2645_s12 = scalar_lea.vmem %s464_s15, 128  ;;  %s2650_s22 = sshll.u32 %s2762_s30, 4  ;;  %s2651_s22 = int_to_ptr.vmem [resolvable:$false] %s2650_s22 }
  0x7a   : > { %p2646_p2 = scmp.ne.s32.totalorder %s464_s15, %s2645_s12  ;;  %s2652_s27 = scalar_lea.vmem %s2651_s22, 256 }
  0x7b   : > { %p2653_p7 = scmp.lt.s32.totalorder %s464_s15, %s2651_s22  ;;  %p2654_p4 = scmp.lt.s32.totalorder %s2652_s27, %s2645_s12 }
  0x7c   : > { %p2648_p10 = pnand %p2646_p2, %p3326_p5 }
  0x7d   : > { %p2655_p8 = por %p2654_p4, %p2653_p7 }
  0x7e   : > { %p2649_p1 = pneg %p2648_p10 }
  0x80   : > { %p2656_p6 = pnand %p2655_p8, %p2649_p1 }
  0x82   : > { %2659 = shalt.err (!%p2656_p6)
}
  0x83   : > { %2370 = dma.hbm_to_vmem [thread:$0]  (!%p2949_p0), %s461_s5, 128, %s464_s15, %s2959_s17  }
  0x84   : > { %472 = sbr.rel (%p2867_p3) target bundleno = 1459 (0x5b3), region = 64  ;;  %s3022_s26 = sand.u32 (!%p2867_p3), 1, %s2736_s18  }
  0x85   : > { %s3025_s13 = sshll.u32 (!%p2867_p3), %s3022_s26, 3  ;;  %s475_s7 = scalar_lea.sflag (!%p2867_p3), [#allocation7], %s3022_s26 }
  0x86   : > { %s478_s28 = scalar_lea.vmem (!%p2867_p3), [#allocation6], %s3025_s13 }
  0x89   : > { %2711 = dma.done.wait (%p2923_p11), %s475_s7, 128  }
  0x8a   : > { %2713 = vsyncadd (%p2923_p11), %s475_s7, 4294967168  ;;  %s483_s3 = sand.u32 1, %s2862_s23   ;;  %s487_s17 = scalar_lea.vmem [#allocation9], %s3025_s13 }
  0x8b   : > { %s484_s5 = scalar_lea.sflag [#allocation10], %s483_s3 }
  0x8c   : > { %2715 = dma.done.wait (%p2923_p11), %s484_s5, 256  }
  0x8d   : > { %2717 = vsyncadd (%p2923_p11), %s484_s5, 4294967040  ;;  %s496_s24 = scalar_lea.vmem [#allocation11], %s3025_s13  ;;  %p3327_p3 = scmp.eq.s32.totalorder %s2862_s23, 0 }
  0x8f   : > { %2719 = dma.done.wait (%p3327_p3), [#allocation13], 1024   ;;  %p3328_p0 = pmov %p3327_p3 }
  0x91   : > { %2721 = vsyncadd (%p3328_p0), [#allocation13], 4294966272  ;;  %p3329_p13 = pmov %p3328_p0 }
  0x92   : > { %p3330_p9 = pmov %p3328_p0 }
  0x93   : > { %2723 = dma.done.wait (%p3329_p13), [#allocation16], 1024  }
  0x94   : > { %2725 = vsyncadd (%p3330_p9), [#allocation16], 4294966272  ;;  %v2763_v0 = vmov 0.0   ;;  %vm2764_vm0 = vmmov 0   ;;  %v569_v1 = vld [vmem:[#allocation12 + $0x18] sm:$0xff]  ;;  %v568_v3 = vld [vmem:[#allocation12 + $0x10] sm:$0xff] }
  0x95   : > { %2231 = vmatprep.subr.mxu0 %v2763_v0  ;;  %2242 = vmatprep.subr.mxu1 %v2763_v0  ;;  %v686_v2 = vld [vmem:[#allocation14 + $0x18] sm:$0xff]  ;;  %v685_v4 = vld [vmem:[#allocation14 + $0x10] sm:$0xff]  ;;  %v567_v5 = vld [vmem:[#allocation12 + $0x8] sm:$0xff]  ;;  %vm577_vm1 = vcmask 261120   ;;  %vm651_vm2 = vcmask 64512   ;;  %s2765_s11 = smov 120  }
  0x96   : > { %2239 = vmatprep.mubr.msk.f32.mxu0 %vm2764_vm0, %v2763_v0  ;;  %2250 = vmatprep.mubr.msk.f32.mxu1 %vm2764_vm0, %v2763_v0  ;;  %v684_v6 = vld [vmem:[#allocation14 + $0x8] sm:$0xff]  ;;  %v566_v7 = vld [vmem:[#allocation12] sm:$0xff]  ;;  %v565_v9 = vld [vmem:[%s478_s28] sm:$0xff]  ;;  %678 = vst.msk [vmem:[#allocation5] sm:$0xff] %vm651_vm2, %v2763_v0  ;;  %s2766_s21 = smov 104   ;;  %s2767_s10 = smov 112  }
  0x97   : > { %2232 = vmatpush3.msra.mxu0 %v569_v1  ;;  %2243 = vmatpush3.msra.mxu1 %v686_v2  ;;  %v683_v8 = vld [vmem:[#allocation14] sm:$0xff]  ;;  %679 = vst.msk [vmem:[#allocation5 + $0x8] sm:$0xff] %vm651_vm2, %v2763_v0  ;;  %680 = vst.msk [vmem:[#allocation5 + $0x10] sm:$0xff] %vm651_vm2, %v2763_v0  ;;  %v772_v11 = vld [vmem:[#allocation15 + $0x18] sm:$0xff]  ;;  %vm669_vm3 = vcmask 7168   ;;  %v2768_v38 = vmov -inf  }
  0x98   : > { %2233 = vmatprep.subr.mxu0 %v2763_v0  ;;  %2244 = vmatprep.subr.mxu1 %v2763_v0  ;;  %v682_v10 = vld [vmem:[%s487_s17] sm:$0xff]  ;;  %681 = vst.msk [vmem:[#allocation5 + $0x18] sm:$0xff] %vm651_vm2, %v2763_v0  ;;  %v771_v12 = vld [vmem:[#allocation15 + $0x10] sm:$0xff]  ;;  %v2769_v42 = vmov 0   ;;  %s3331_s30 = sld [smem:[#allocation28_spill]]  ;;  %s2189_s29 = sshll.u32 %s2744_s20, 7 }
  0x99   : > { %2234 = vmatpush3.msra.mxu0 %v568_v3  ;;  %2245 = vmatpush3.msra.mxu1 %v685_v4  ;;  %v770_v13 = vld [vmem:[#allocation15 + $0x8] sm:$0xff]  ;;  %v769_v14 = vld [vmem:[#allocation15] sm:$0xff]  ;;  %v768_v15 = vld [vmem:[%s496_s24] sm:$0xff]  ;;  %670 = vst.msk [vmem:[#allocation3] sm:$0xff] %vm669_vm3, %v2768_v38  ;;  %s3332_s25 = sld [smem:[#allocation35_spill]]  ;;  %s560_s7 = scalar_lea.vmem [#allocation18], %s3025_s13 }
  0x9a   : > { %2235 = vmatprep.subr.mxu0 %v2763_v0  ;;  %2246 = vmatprep.subr.mxu1 %v2763_v0  ;;  %v2165_v16 = vld [vmem:[%s3270_s4] ss:$0 sm:$0xff]  ;;  %671 = vst.msk [vmem:[#allocation3 + $0x8] sm:$0xff] %vm669_vm3, %v2768_v38  ;;  %672 = vst.msk [vmem:[#allocation3 + $0x10] sm:$0xff] %vm669_vm3, %v2768_v38  ;;  %s1976_s28 = sshll.u32 %s560_s7, 4  ;;  %s3333_s17 = sld [smem:[#allocation36_spill]]  ;;  %s1977_s28 = int_to_ptr.vmem [resolvable:$true] %s1976_s28 }
  0x9b   : > { %2236 = vmatpush3.msra.mxu0 %v567_v5  ;;  %2247 = vmatpush3.msra.mxu1 %v684_v6  ;;  %v2167_v17 = vld [vmem:[%s3272_s6] ss:$0 sm:$0xff]  ;;  %673 = vst.msk [vmem:[#allocation3 + $0x18] sm:$0xff] %vm669_vm3, %v2768_v38  ;;  %674 = vst.msk [vmem:[#allocation4] sm:$0xff] %vm669_vm3, %v2763_v0  ;;  %s1962_s16 = scalar_lea.sflag [#allocation8], %s3022_s26  ;;  %s2660_s1 = scalar_lea.vmem %s1977_s28, 128 }
  0x9c   : > { %2237 = vmatprep.subr.mxu0 %v2763_v0  ;;  %2248 = vmatprep.subr.mxu1 %v2763_v0  ;;  %v2169_v34 = vld [vmem:[%s3274_s8] ss:$0 sm:$0xff]  ;;  %675 = vst.msk [vmem:[#allocation4 + $0x8] sm:$0xff] %vm669_vm3, %v2763_v0  ;;  %676 = vst.msk [vmem:[#allocation4 + $0x10] sm:$0xff] %vm669_vm3, %v2763_v0  ;;  %p2661_p11 = scmp.ne.s32.totalorder %s1977_s28, %s2660_s1  ;;  %s2770_s14 = smov [#allocation18]  }
  0x9d   : > { %2238 = vmatpush3.msra.mxu0 %v566_v7  ;;  %2249 = vmatpush3.msra.mxu1 %v683_v8  ;;  %677 = vst.msk [vmem:[#allocation4 + $0x18] sm:$0xff] %vm669_vm3, %v2763_v0  ;;  %s2664_s20 = sshll.u32 %s2770_s14, 4  ;;  %s2665_s20 = int_to_ptr.vmem [resolvable:$false] %s2664_s20 }
  0x9e   : > { %2240 = vmatmul.mubr.msk.f32.vlgmr.msra.gmra.mxu0 %vm577_vm1, %v565_v9  ;;  %2251 = vmatmul.mubr.msk.f32.vlgmr.msra.gmra.mxu1 %vm577_vm1, %v682_v10  ;;  %p3335_p12 = scmp.ne.s32.totalorder %s3331_s30, 0  ;;  %s2666_s13 = scalar_lea.vmem %s2665_s20, 256 }
  0x9f   : > { %2264 = vmatprep.subr.mxu1 %v2763_v0  ;;  %2266 = vmatprep.mubr.msk.f32.mxu1 %vm2764_vm0, %v2763_v0  ;;  %p2667_p10 = scmp.lt.s32.totalorder %s1977_s28, %s2665_s20  ;;  %p2668_p1 = scmp.lt.s32.totalorder %s2666_s13, %s2660_s1 }
  0xa0   : > { %2253 = vmatprep.subr.mxu0 %v2763_v0  ;;  %2261 = vmatprep.mubr.msk.f32.mxu0 %vm2764_vm0, %v2763_v0  ;;  %v3145_v52 = vld [vmem:[#allocation3] sm:$0xff]  ;;  %s3334_s24 = smov %s3333_s17  ;;  %s1974_s23 = scalar_lea.hbm %s3333_s17, %s2189_s29 }
  0xa1   : > { %2254 = vmatpush3.msra.mxu0 %v772_v11  ;;  %2446 = vset.pattern.permute.xlu1 %v2769_v42  ;;  %v1118_v56 = vld [vmem:[#allocation3 + $0x8] sm:$0xff]  ;;  %v3155_v59 = vld [vmem:[#allocation3 + $0x10] sm:$0xff]  ;;  %p2662_p2 = pnand %p2661_p11, %p3335_p12  ;;  %p2669_p7 = por %p2668_p1, %p2667_p10 }
  0xa2   : > { %2255 = vmatprep.subr.mxu0 %v2763_v0  ;;  %2447 = vset.pattern.permute.xlu0 %v2769_v42  ;;  %v1501_v62 = vld [vmem:[#allocation3 + $0x18] sm:$0xff] }
  0xa3   : > { %2256 = vmatpush3.msra.mxu0 %v771_v12  ;;  %p2663_p5 = pneg %p2662_p2 }
  0xa4   : > { %2257 = vmatprep.subr.mxu0 %v2763_v0 }
  0xa5   : > { %2258 = vmatpush3.msra.mxu0 %v770_v13  ;;  %p2670_p4 = pnand %p2669_p7, %p2663_p5 }
  0xa6   : > { %2259 = vmatprep.subr.mxu0 %v2763_v0 }
  0xa7   : > { %2260 = vmatpush3.msra.mxu0 %v769_v14 }
  0xa8   : > { %2262 = vmatmul.mubr.msk.f32.vlgmr.msra.gmra.mxu0 %vm577_vm1, %v768_v15  ;;  %2274 = vmatprep.subr.mxu0 %v2763_v0 }
  0xa9   : > { %2276 = vmatprep.mubr.msk.f32.mxu0 %vm2764_vm0, %v2763_v0 }
 0x15e   : > { %v647_v18 = vpop.f32.mrf.mxu0  ;;  %v764_v19 = vpop.f32.mrf.mxu1 }
 0x15f   : > { %v648_v20 = vadd.f32 %v2165_v16, %v647_v18  ;;  %v765_v21 = vadd.f32 %v2167_v17, %v764_v19 }
 0x160   : > { %v2241_v22 = vpop.f32.mrf.mxu0  ;;  %v2252_v23 = vpop.f32.mrf.mxu1 }
 0x161   : > { %652 = vst.msk [vmem:[#allocation2] sm:$0xff] %vm651_vm2, %v648_v20  ;;  %1040 = vrot.lane.b32.xlu1 %v765_v21, %s2765_s11  ;;  %654 = vrot.lane.b32.xlu0 %v648_v20, %s2765_s11 }
 0x162   : > { %2265 = vmatpush3.xpose.msk.msra.mxu1 %vm651_vm2, %v765_v21 }
 0x163   : > { %2269 = vmatprep.subr.mxu1 %v2763_v0 }
 0x165   : > { %664 = vrot.lane.b32.xlu1 %v648_v20, %s2766_s21  ;;  %659 = vrot.lane.b32.xlu0 %v648_v20, %s2767_s10 }
 0x168   : > { %v853_v24 = vld [vmem:[#allocation2] sm:$0xff]  ;;  %v849_v35 = vpop.f32.mrf.mxu0 }
 0x169   : > { %1423 = vrot.lane.b32.xlu1 %v765_v21, %s2766_s21  ;;  %1232 = vrot.lane.b32.xlu0 %v765_v21, %s2767_s10  ;;  %v850_v36 = vadd.f32 %v2169_v34, %v849_v35  ;;  %v947_v35 = vld [vmem:[#allocation4] sm:$0xff] }
 0x16a   : > { %2267 = vmatmul.mubr.msk.f32.vlgmr.msra.gmra.mxu1 %vm651_vm2, %v853_v24  ;;  %v2263_v37 = vpop.f32.mrf.mxu0 }
 0x16b   : > { %2271 = vmatprep.mubr.msk.f32.mxu1 %vm2764_vm0, %v2763_v0  ;;  %2270 = vmatpush3.msra.mxu1 %v850_v36 }
 0x16c   : > { %2279 = vmatprep.subr.mxu1 %v2763_v0 }
 0x1d3   : > { %v1041_v25 = vpop.permute.xlu1 %1040  ;;  %v655_v26 = vpop.permute.xlu0 %654 }
 0x1d4   : > { %658 = vst.msk [vmem:[#allocation2 + $0x8] sm:$0xff] %vm651_vm2, %v655_v26  ;;  %2275 = vmatpush3.xpose.msk.msra.mxu0 %vm651_vm2, %v1041_v25 }
 0x1d5   : > { %2284 = vmatprep.subr.mxu0 %v2763_v0 }
 0x1d7   : > { %v665_v27 = vpop.permute.xlu1 %664  ;;  %v660_v28 = vpop.permute.xlu0 %659 }
 0x1d8   : > { %668 = vst.msk [vmem:[#allocation2 + $0x18] sm:$0xff] %vm651_vm2, %v665_v27  ;;  %663 = vst.msk [vmem:[#allocation2 + $0x10] sm:$0xff] %vm651_vm2, %v660_v28 }
 0x1db   : > { %v1233_v29 = vpop.permute.xlu0 %1232  ;;  %v1039_v30 = vld [vmem:[#allocation2 + $0x8] sm:$0xff]  ;;  %v1424_v32 = vpop.permute.xlu1 %1423 }
 0x1dc   : > { %2277 = vmatmul.mubr.msk.f32.vlgmr.msra.gmra.mxu0 %vm651_vm2, %v1039_v30 }
 0x1dd   : > { %2285 = vmatpush3.xpose.msk.msra.mxu0 %vm651_vm2, %v1233_v29  ;;  %2286 = vmatprep.mubr.msk.f32.mxu0 %vm2764_vm0, %v2763_v0 }
 0x1de   : > { %2294 = vmatprep.subr.mxu0 %v2763_v0 }
 0x1df   : > { %v1231_v31 = vld [vmem:[#allocation2 + $0x10] sm:$0xff]  ;;  %v1422_v33 = vld [vmem:[#allocation2 + $0x18] sm:$0xff] }
 0x1e0   : > { %2287 = vmatmul.mubr.msk.f32.vlgmr.msra.gmra.mxu0 %vm651_vm2, %v1231_v31 }
 0x1e1   : > { %2295 = vmatpush3.xpose.msk.msra.mxu0 %vm651_vm2, %v1424_v32  ;;  %2296 = vmatprep.mubr.msk.f32.mxu0 %vm2764_vm0, %v2763_v0 }
 0x1e2   : > { %2304 = vmatprep.subr.mxu0 %v2763_v0 }
 0x1e4   : > { %2297 = vmatmul.mubr.msk.f32.vlgmr.msra.gmra.mxu0 %vm651_vm2, %v1422_v33 }
 0x1e5   : > { %2306 = vmatprep.mubr.msk.f32.mxu0 %vm2764_vm0, %v2763_v0 }
 0x22a   : > { %v927_v39 = vpop.f32.mrf.mxu1 }
 0x22b   : > { %v932_v40 = vsel %vm651_vm2, %v927_v39, -inf }
 0x22c   : > { %933 = vmax.xlane.f32.xlu0 %v932_v40  ;;  %v2268_v41 = vpop.f32.mrf.mxu1 }
 0x22d   : > { %v1624_v41 = vld [vmem:[#allocation17] sm:$0xff] }
 0x29c   : > { %v1113_v43 = vpop.f32.mrf.mxu0 }
 0x29d   : > { %v1119_v44 = vsel %vm651_vm2, %v1113_v43, -inf }
 0x29e   : > { %1120 = vmax.xlane.f32.xlu1 %v1119_v44  ;;  %v2278_v45 = vpop.f32.mrf.mxu0 }
 0x29f   : > { %v1135_v45 = vld [vmem:[#allocation4 + $0x8] sm:$0xff] }
 0x2a0   : > { %v1305_v46 = vpop.f32.mrf.mxu0 }
 0x2a1   : > { %v1311_v47 = vsel %vm651_vm2, %v1305_v46, -inf }
 0x2a2   : > { %1312 = vmax.xlane.f32.xlu0 %v1311_v47  ;;  %v2288_v48 = vpop.f32.mrf.mxu0 }
 0x2a3   : > { %v1327_v48 = vld [vmem:[#allocation4 + $0x10] sm:$0xff] }
 0x2a4   : > { %v1496_v49 = vpop.f32.mrf.mxu0 }
 0x2a5   : > { %v1502_v50 = vsel %vm651_vm2, %v1496_v49, -inf }
 0x2a6   : > { %1503 = vmax.xlane.f32.xlu0 %v1502_v50  ;;  %v2298_v51 = vpop.f32.mrf.mxu0 }
 0x2b5   : > { %v934_v53 = vpop.xlane.xlu0 %933 }
 0x2b6   : > { %v3148_v54 = vmax.f32 %v3145_v52, %v934_v53 }
 0x2b8   : > { %v936_v55 = vsub.f32 %v3145_v52, %v3148_v54  ;;  %1037 = vst.msk [vmem:[#allocation3] sm:$0xff] %vm669_vm3, %v3148_v54  ;;  %941 = vperm.xlu1 %2446, %v3148_v54   ;;  %v1518_v52 = vld [vmem:[#allocation4 + $0x18] sm:$0xff] }
 0x2ba   : > { %v937_v30 = vmul.f32 1.442695, %v936_v55 }
 0x327   : > { %v1121_v57 = vpop.xlane.xlu1 %1120 }
 0x328   : > { %v1122_v58 = vmax.f32 %v1118_v56, %v1121_v57  ;;  %v955_v57 = vld [vmem:[#allocation5] sm:$0xff] }
 0x32a   : > { %1229 = vst.msk [vmem:[#allocation3 + $0x8] sm:$0xff] %vm669_vm3, %v1122_v58  ;;  %1128 = vperm.xlu0 %2447, %v1122_v58   ;;  %v1123_v8 = vsub.f32 %v1118_v56, %v1122_v58 }
 0x32b   : > { %v1313_v60 = vpop.xlane.xlu0 %1312 }
 0x32c   : > { %v3159_v61 = vmax.f32 %v3155_v59, %v1313_v60  ;;  %v1124_v9 = vmul.f32 1.442695, %v1123_v8 }
 0x32e   : > { %v1315_v63 = vsub.f32 %v3155_v59, %v3159_v61  ;;  %1420 = vst.msk [vmem:[#allocation3 + $0x10] sm:$0xff] %vm669_vm3, %v3159_v61  ;;  %1320 = vperm.xlu1 %2446, %v3159_v61  }
 0x32f   : > { %v1504_v1 = vpop.xlane.xlu0 %1503 }
 0x330   : > { %v1505_v2 = vmax.f32 %v1501_v62, %v1504_v1  ;;  %v1316_v33 = vmul.f32 1.442695, %v1315_v63  ;;  %v1635_v1 = vld [vmem:[#allocation17 + $0x8] sm:$0xff] }
 0x331   : > { %2305 = vmatpush3.msra.mxu0 %v1635_v1 }
 0x332   : > { %1611 = vst.msk [vmem:[#allocation3 + $0x18] sm:$0xff] %vm669_vm3, %v1505_v2  ;;  %1511 = vperm.xlu1 %2446, %v1505_v2   ;;  %v1506_v10 = vsub.f32 %v1501_v62, %v1505_v2  ;;  %2314 = vmatprep.subr.mxu0 %v2763_v0 }
 0x333   : > { %v942_v3 = vpop.permute.xlu1 %941 }
 0x334   : > { %v944_v4 = vsub.f32 %v927_v39, %v942_v3  ;;  %v1507_v11 = vmul.f32 1.442695, %v1506_v10  ;;  %v1877_v10 = vld [vmem:[#allocation17 + $0x18] sm:$0xff] }
 0x336   : > { %v945_v5 = vmul.f32 1.442695, %v944_v4  ;;  %1151 = vrot.lane.b32.xlu1 %v850_v36, %s2765_s11 }
 0x338   : > { %2448 = vpow2.f32 %v945_v5 }
 0x339   : > { %2450 = vpow2.f32 %v1124_v9 }
 0x33a   : > { %1342 = vrot.lane.b32.xlu1 %v850_v36, %s2767_s10  ;;  %2452 = vpow2.f32 %v1507_v11  ;;  %v1143_v11 = vld [vmem:[#allocation5 + $0x8] sm:$0xff] }
 0x33e   : > { %1533 = vrot.lane.b32.xlu1 %v850_v36, %s2766_s21 }
 0x345   : > { %v2449_v6 = vpop.eup %2448 }
 0x346   : > { %2272 = vmatmul.mubr.msk.f32.vlgmr.msra.gmra.mxu1 %vm651_vm2, %v2449_v6  ;;  %v949_v7 = vsel %vm651_vm2, %v2449_v6, 0.0  ;;  %v3174_v12 = vpop.eup %2450 }
 0x347   : > { %2281 = vmatprep.mubr.msk.f32.mxu1 %vm2764_vm0, %v2763_v0  ;;  %v3177_v13 = vpop.eup %2452 }
 0x348   : > { %v1519_v54 = vmul.f32 %v3177_v13, %v1518_v52 }
 0x349   : > { %950 = vadd.xlane.f32.xlu0 %v949_v7 }
 0x35f   : > { %1146 = vperm.xlu0 %2447, %v3174_v12  }
 0x363   : > { %1529 = vperm.xlu0 %2447, %v3177_v13   ;;  %v1335_v13 = vld [vmem:[#allocation5 + $0x10] sm:$0xff] }
 0x3a5   : > { %v1129_v14 = vpop.permute.xlu0 %1128 }
 0x3a6   : > { %v1131_v15 = vsub.f32 %v1113_v43, %v1129_v14 }
 0x3a8   : > { %v1132_v16 = vmul.f32 1.442695, %v1131_v15 }
 0x3a9   : > { %v1321_v17 = vpop.permute.xlu1 %1320 }
 0x3aa   : > { %2454 = vpow2.f32 %v1132_v16  ;;  %v1323_v18 = vsub.f32 %v1305_v46, %v1321_v17  ;;  %v1136_v46 = vmul.f32 %v3174_v12, %v1135_v45  ;;  %v2187_v45 = vld [vmem:[%s3332_s25] ss:$0 sm:$0xff] }
 0x3ac   : > { %v1324_v19 = vmul.f32 1.442695, %v1323_v18 }
 0x3ad   : > { %v1512_v20 = vpop.permute.xlu1 %1511 }
 0x3ae   : > { %2456 = vpow2.f32 %v1324_v19  ;;  %v1514_v21 = vsub.f32 %v1496_v49, %v1512_v20  ;;  %v1526_v19 = vld [vmem:[#allocation5 + $0x18] sm:$0xff] }
 0x3b0   : > { %v1515_v22 = vmul.f32 1.442695, %v1514_v21 }
 0x3b1   : > { %v1152_v23 = vpop.permute.xlu1 %1151 }
 0x3b2   : > { %2458 = vpow2.f32 %v1515_v22  ;;  %2280 = vmatpush3.msra.mxu1 %v1152_v23 }
 0x3b3   : > { %2289 = vmatprep.subr.mxu1 %v2763_v0  ;;  %2460 = vpow2.f32 %v937_v30  ;;  %v1792_v30 = vld [vmem:[#allocation17 + $0x10] sm:$0xff] }
 0x3b4   : > { %2462 = vpow2.f32 %v1316_v33 }
 0x3b5   : > { %v1343_v24 = vpop.permute.xlu1 %1342 }
 0x3b7   : > { %v2455_v25 = vpop.eup %2454 }
 0x3b8   : > { %2282 = vmatmul.mubr.msk.f32.vlgmr.msra.gmra.mxu1 %vm651_vm2, %v2455_v25  ;;  %v1137_v26 = vsel %vm651_vm2, %v2455_v25, 0.0 }
 0x3b9   : > { %2290 = vmatpush3.msra.mxu1 %v1343_v24  ;;  %1138 = vadd.xlane.f32.xlu1 %v1137_v26  ;;  %v1534_v28 = vpop.permute.xlu1 %1533 }
 0x3ba   : > { %2291 = vmatprep.mubr.msk.f32.mxu1 %vm2764_vm0, %v2763_v0  ;;  %2299 = vmatprep.subr.mxu1 %v2763_v0 }
 0x3bb   : > { %v2457_v27 = vpop.eup %2456 }
 0x3bc   : > { %2292 = vmatmul.mubr.msk.f32.vlgmr.msra.gmra.mxu1 %vm651_vm2, %v2457_v27  ;;  %v1329_v29 = vsel %vm651_vm2, %v2457_v27, 0.0 }
 0x3bd   : > { %2300 = vmatpush3.msra.mxu1 %v1534_v28  ;;  %1330 = vadd.xlane.f32.xlu1 %v1329_v29 }
 0x3be   : > { %2301 = vmatprep.mubr.msk.f32.mxu1 %vm2764_vm0, %v2763_v0  ;;  %2309 = vmatprep.subr.mxu1 %v2763_v0 }
 0x3bf   : > { %v2459_v31 = vpop.eup %2458 }
 0x3c0   : > { %2302 = vmatmul.mubr.msk.f32.vlgmr.msra.gmra.mxu1 %vm651_vm2, %v2459_v31  ;;  %v1520_v32 = vsel %vm651_vm2, %v2459_v31, 0.0  ;;  %v2461_v34 = vpop.eup %2460 }
 0x3c1   : > { %1521 = vadd.xlane.f32.xlu1 %v1520_v32  ;;  %2311 = vmatprep.mubr.msk.f32.mxu1 %vm2764_vm0, %v2763_v0  ;;  %v948_v36 = vmul.f32 %v2461_v34, %v947_v35  ;;  %v2463_v39 = vpop.eup %2462 }
 0x3c2   : > { %2310 = vmatpush3.msra.mxu1 %v1624_v41  ;;  %v1328_v50 = vmul.f32 %v2463_v39, %v1327_v48 }
 0x3c3   : > { %2319 = vmatprep.subr.mxu1 %v2763_v0 }
 0x3d2   : > { %958 = vperm.xlu1 %2446, %v2461_v34   ;;  %v951_v37 = vpop.xlane.xlu0 %950 }
 0x3d3   : > { %v952_v38 = vadd.f32 %v951_v37, %v948_v36 }
 0x3d5   : > { %954 = vst.msk [vmem:[#allocation4] sm:$0xff] %vm669_vm3, %v952_v38 }
 0x3d6   : > { %1338 = vperm.xlu1 %2446, %v2463_v39  }
 0x3da   : > { %v1147_v3 = vpop.permute.xlu0 %1146 }
 0x3db   : > { %v1149_v12 = vmul.f32 %v1147_v3, %v1143_v11 }
 0x3dc   : > { %v1616_v40 = vld [vmem:[#allocation4] sm:$0xff] }
 0x3dd   : > { %2464 = vrcp.f32 %v1616_v40 }
 0x3de   : > { %v1530_v6 = vpop.permute.xlu0 %1529 }
 0x3df   : > { %v1532_v23 = vmul.f32 %v1530_v6, %v1526_v19 }
 0x3ea   : > { %v2465_v42 = vpop.eup %2464 }
 0x3eb   : > { %1620 = vperm.xlu0 %2447, %v2465_v42  }
 0x406   : > { %v1031_v43 = vpop.f32.mrf.mxu1 }
 0x408   : > { %v2273_v44 = vpop.f32.mrf.mxu1 }
 0x442   : > { %v1139_v47 = vpop.xlane.xlu1 %1138 }
 0x443   : > { %v1140_v49 = vadd.f32 %v1139_v47, %v1136_v46 }
 0x445   : > { %1141 = vst.msk [vmem:[#allocation4 + $0x8] sm:$0xff] %vm669_vm3, %v1140_v49 }
 0x446   : > { %v1331_v51 = vpop.xlane.xlu1 %1330 }
 0x447   : > { %v1332_v53 = vadd.f32 %v1331_v51, %v1328_v50 }
 0x449   : > { %1333 = vst.msk [vmem:[#allocation4 + $0x10] sm:$0xff] %vm669_vm3, %v1332_v53 }
 0x44a   : > { %v1522_v55 = vpop.xlane.xlu1 %1521 }
 0x44b   : > { %v1523_v56 = vadd.f32 %v1522_v55, %v1519_v54 }
 0x44c   : > { %v1626_v58 = vld [vmem:[#allocation4 + $0x8] sm:$0xff] }
 0x44d   : > { %1524 = vst.msk [vmem:[#allocation4 + $0x18] sm:$0xff] %vm669_vm3, %v1523_v56  ;;  %2466 = vrcp.f32 %v1626_v58 }
 0x44e   : > { %v959_v59 = vpop.permute.xlu1 %958 }
 0x44f   : > { %v961_v60 = vmul.f32 %v959_v59, %v955_v57 }
 0x450   : > { %v1783_v61 = vld [vmem:[#allocation4 + $0x10] sm:$0xff] }
 0x451   : > { %v1035_v62 = vadd.f32 %v1031_v43, %v961_v60  ;;  %2468 = vrcp.f32 %v1783_v61 }
 0x452   : > { %v1339_v14 = vpop.permute.xlu1 %1338 }
 0x453   : > { %1036 = vst.msk [vmem:[#allocation5] sm:$0xff] %vm651_vm2, %v1035_v62  ;;  %v1341_v18 = vmul.f32 %v1339_v14, %v1335_v13 }
 0x454   : > { %v1868_v63 = vld [vmem:[#allocation4 + $0x18] sm:$0xff] }
 0x455   : > { %2470 = vrcp.f32 %v1868_v63 }
 0x45a   : > { %v2467_v2 = vpop.eup %2466  ;;  %v1615_v7 = vld [vmem:[#allocation5] sm:$0xff] }
 0x45b   : > { %1630 = vperm.xlu1 %2446, %v2467_v2  }
 0x45e   : > { %v2469_v4 = vpop.eup %2468 }
 0x45f   : > { %1787 = vperm.xlu1 %2446, %v2469_v4  }
 0x462   : > { %v2471_v5 = vpop.eup %2470 }
 0x463   : > { %1872 = vperm.xlu0 %2447, %v2471_v5  }
 0x466   : > { %v1621_v8 = vpop.permute.xlu0 %1620 }
 0x467   : > { %v1623_v9 = vmul.f32 %v1621_v8, %v1615_v7 }
 0x469   : > { %2312 = vmatmul.mubr.msk.f32.vlgmr.msra.gmra.mxu1 %vm651_vm2, %v1623_v9 }
 0x46a   : > { %2320 = vmatpush3.msra.mxu1 %v1877_v10  ;;  %2321 = vmatprep.mubr.msk.f32.mxu1 %vm2764_vm0, %v2763_v0 }
 0x478   : > { %v1223_v15 = vpop.f32.mrf.mxu1 }
 0x479   : > { %v1227_v16 = vadd.f32 %v1223_v15, %v1149_v12 }
 0x47a   : > { %v2283_v17 = vpop.f32.mrf.mxu1 }
 0x47b   : > { %1228 = vst.msk [vmem:[#allocation5 + $0x8] sm:$0xff] %vm651_vm2, %v1227_v16 }
 0x47c   : > { %v1414_v20 = vpop.f32.mrf.mxu1 }
 0x47d   : > { %v1418_v21 = vadd.f32 %v1414_v20, %v1341_v18 }
 0x47e   : > { %v2293_v22 = vpop.f32.mrf.mxu1 }
 0x47f   : > { %1419 = vst.msk [vmem:[#allocation5 + $0x10] sm:$0xff] %vm651_vm2, %v1418_v21 }
 0x480   : > { %v1605_v24 = vpop.f32.mrf.mxu1 }
 0x481   : > { %v1609_v25 = vadd.f32 %v1605_v24, %v1532_v23 }
 0x482   : > { %v2303_v26 = vpop.f32.mrf.mxu1  ;;  %v1625_v28 = vld [vmem:[#allocation5 + $0x8] sm:$0xff] }
 0x483   : > { %1610 = vst.msk [vmem:[#allocation5 + $0x18] sm:$0xff] %vm651_vm2, %v1609_v25 }
 0x486   : > { %v1782_v31 = vld [vmem:[#allocation5 + $0x10] sm:$0xff] }
 0x48a   : > { %v1867_v34 = vld [vmem:[#allocation5 + $0x18] sm:$0xff] }
 0x4d6   : > { %v1631_v27 = vpop.permute.xlu1 %1630 }
 0x4d7   : > { %v1633_v29 = vmul.f32 %v1631_v27, %v1625_v28 }
 0x4d9   : > { %2307 = vmatmul.mubr.msk.f32.vlgmr.msra.gmra.mxu0 %vm651_vm2, %v1633_v29 }
 0x4da   : > { %v1788_v32 = vpop.permute.xlu1 %1787  ;;  %2315 = vmatpush3.msra.mxu0 %v1792_v30  ;;  %2316 = vmatprep.mubr.msk.f32.mxu0 %vm2764_vm0, %v2763_v0 }
 0x4db   : > { %v1790_v33 = vmul.f32 %v1788_v32, %v1782_v31 }
 0x4dd   : > { %2317 = vmatmul.mubr.msk.f32.vlgmr.msra.gmra.mxu0 %vm651_vm2, %v1790_v33 }
 0x4de   : > { %v1873_v35 = vpop.permute.xlu0 %1872 }
 0x4df   : > { %v1875_v36 = vmul.f32 %v1873_v35, %v1867_v34 }
 0x4e1   : > { %2322 = vmatmul.mubr.msk.f32.vlgmr.msra.gmra.mxu1 %vm651_vm2, %v1875_v36 }
 0x529   : > { %v1778_v37 = vpop.f32.mrf.mxu1 }
 0x52b   : > { %v2313_v38 = vpop.f32.mrf.mxu1 }
 0x599   : > { %v1705_v39 = vpop.f32.mrf.mxu0 }
 0x59a   : > { %v1779_v42 = vadd.f32 %v1778_v37, %v1705_v39 }
 0x59b   : > { %v2308_v40 = vpop.f32.mrf.mxu0 }
 0x59d   : > { %v1862_v41 = vpop.f32.mrf.mxu0 }
 0x59e   : > { %v1866_v0 = vadd.f32 %v1862_v41, %v1779_v42 }
 0x59f   : > { %v2318_v43 = vpop.f32.mrf.mxu0 }
 0x5a1   : > { %v1947_v44 = vpop.f32.mrf.mxu1 }
 0x5a2   : > { %v1951_v46 = vadd.f32 %v1947_v44, %v1866_v0 }
 0x5a3   : > { %v2323_v47 = vpop.f32.mrf.mxu1 }
 0x5a4   : > { %v1959_v48 = vadd.f32 %v2187_v45, %v1951_v46 }
 0x5a6   : > { %1960 = vst.msk [vmem:[%s560_s7] sm:$0xff] %vm577_vm1, %v1959_v48 }
 0x5a7   : > { %2673 = shalt.err (!%p2670_p4)
}
 0x5a8   : > { %s2674_s11 = scalar_lea.hbm %s1974_s23, 128  ;;  %s2678_s10 = scalar_lea.hbm %s3334_s24, 256 }
 0x5a9   : > { %p2675_p8 = scmp.ne.s32.totalorder %s1974_s23, %s2674_s11  ;;  %p2679_p0 = scmp.lt.s32.totalorder %s1974_s23, %s3334_s24 }
 0x5aa   : > { %p2680_p13 = scmp.lt.s32.totalorder %s2678_s10, %s2674_s11 }
 0x5ab   : > { %p2676_p6 = pnand %p2675_p8, %p3335_p12 }
 0x5ac   : > { %p2681_p9 = por %p2680_p13, %p2679_p0 }
 0x5ad   : > { %p2677_p3 = pneg %p2676_p6 }
 0x5af   : > { %p2682_p11 = pnand %p2681_p9, %p2677_p3 }
 0x5b1   : > { %2685 = shalt.err (!%p2682_p11)
}
 0x5b2   : > { %2346 = dma.vmem_to_hbm [thread:$0]  (%p3335_p12), %s1977_s28, 128, %s1974_s23, %s1962_s16  }
 0x5b3 PF: > { %s3336_s22 = sld [smem:[#allocation24_spill]] }
 0x5b4   : > { %s3337_s27 = sld [smem:[#allocation30_spill]] }
 0x5b5   : > { %s3338_s25 = sld [smem:[#allocation26_spill]] }
 0x5b9   : > { %s1988_s29 = sand.u32 1, %s3336_s22  }
 0x5ba   : > { %p3339_p2 = scmp.ne.s32.totalorder %s3337_s27, 0  ;;  %s1989_s7 = scalar_lea.sflag [#allocation8], %s1988_s29 }
 0x5bb   : > { %p3340_p5 = scmp.ge.s32.totalorder %s3338_s25, 2 }
 0x5bd   : > { %p2372_p10 = pnand %p3340_p5, %p3339_p2 }
 0x5bf   : > { %p2373_p1 = pneg %p2372_p10 }
 0x5c1   : > { %2727 = dma.done.wait (%p2373_p1), %s1989_s7, 128  }
 0x5c2   : > { %2729 = vsyncadd (%p2373_p1), %s1989_s7, 4294967168  ;;  %s32_s22 = sadd.s32 1, %s3338_s25   ;;  %s3341_s3 = sld [smem:[#allocation29_spill]] }
 0x5c3   : > { %p29_p7 = scmp.ge.s32.totalorder %s32_s22, 4   ;;  %s3342_s20 = sld [smem:[#allocation25_spill]] }
 0x5c4   : > { %s3343_s21 = sld [smem:[#allocation27_spill]]  ;;  %s3344_s17 = smov %s2736_s18 }
 0x5c5   : > { %s3345_s18 = smov %s2740_s19  ;;  %31 = sbr.rel (!%p29_p7) target bundleno = 17 (0x11), region = 175 }
 0x5c8   : > { %s3346_s19 = smov %s3341_s3 }
 0x5ca   :  { %1994 = vsyncpa [#allocation7], 1 }
 0x5cb   :  { %1996 = vsyncpa [#allocation7 + $0x1], 1 }
 0x5cc   :  { %1997 = vsyncpa [#allocation10], 1 }
 0x5cd   :  { %1999 = vsyncpa [#allocation10 + $0x1], 1 }
 0x5ce   :  { %2000 = vsyncpa [#allocation13], 1 }
 0x5cf   :  { %2001 = vsyncpa [#allocation16], 1 }
 0x5d0   :  { %2002 = vsyncpa [#allocation8], 1 }
 0x5d1   :  { %2004 = vsyncpa [#allocation8 + $0x1], 1 }

</bundles_post_ra>
